<compile_context>
chip_gen: v6e
topology: v6e:2x2x1
jax: 0.10.0
libtpu: 0.0.40
codegen_flags: <defaults>
</compile_context>

<pallas_src>
import jax
import jax.numpy as jnp
from jax.experimental import pallas as pl
from jax.experimental.pallas import tpu as pltpu

N_FEATS = 68 * 3          # 204 input / output features
PAD_FEATS = 256           # lane-dense padded feature dim (multiple of 128)
ENC_DIM = 1024            # encoder output width
BS = 8                    # samples processed per grid step (sublane aligned)

ENC_SIZES = [N_FEATS, 256, 512, ENC_DIM]   # encoder Feedforward layers
VOTE_SIZES = [ENC_DIM, 512, N_FEATS]       # voter Feedforward layers


def _consensus_kernel(x_ref, wp_ref, bp_ref, out_ref):
    # x_ref  : (n_views, BS, PAD_FEATS) bf16  — views of BS samples
    # wp_ref : (2*PAD_FEATS, ENC_DIM)   bf16  — [W_enc ; W_vote^T] packed
    # bp_ref : (2, ENC_DIM)             f32   — [b_enc ; b_vote (padded)]
    # out_ref: (BS, PAD_FEATS)          f32
    n_views = x_ref.shape[0]
    pad = x_ref.shape[2]

    we = wp_ref[0:pad, :]                 # (256, 1024) bf16, folded encoder
    wv_t = wp_ref[pad:2 * pad, :]         # (256, 1024) bf16, folded voter^T
    b_enc = bp_ref[0:1, :]                # (1, 1024) f32
    b_vote = bp_ref[1:2, 0:pad]           # (1, 256)  f32

    # Encoder per view (folded Linear chain + sigmoid), then max over views.
    pool = None
    for v in range(n_views):              # small static unroll
        h = jnp.dot(x_ref[v], we, preferred_element_type=jnp.float32) + b_enc
        e = jax.nn.sigmoid(h)              # (BS, 1024) f32
        pool = e if pool is None else jnp.maximum(pool, e)

    # Voter (folded Linear chain + sigmoid); contract on the shared 1024 dim.
    vote = jax.lax.dot_general(
        pool.astype(jnp.bfloat16), wv_t,
        (((1,), (1,)), ((), ())),
        preferred_element_type=jnp.float32)            # (BS, 256) f32
    out_ref[...] = jax.nn.sigmoid(vote + b_vote)


def fold_and_pack_params(params):
    """Fold the Linear chains (no inter-layer nonlinearity) and pack buffers."""
    (w1, b1), (w2, b2), (w3, b3), (v1, c1), (v2, c2) = params
    hp = jax.lax.Precision.HIGHEST
    w_enc = jnp.dot(jnp.dot(w1, w2, precision=hp), w3, precision=hp)        # (204, 1024)
    b_enc = jnp.dot(jnp.dot(b1, w2, precision=hp) + b2, w3, precision=hp) + b3
    w_vote = jnp.dot(v1, v2, precision=hp)                                  # (1024, 204)
    b_vote = jnp.dot(c1, v2, precision=hp) + c2                             # (1, 204)

    # Zero-pad feature dim 204 -> 256 and pack weights into one bf16 slab.
    w_enc_p = jnp.zeros((PAD_FEATS, ENC_DIM), jnp.float32).at[:N_FEATS, :].set(w_enc)
    w_vote_tp = jnp.zeros((PAD_FEATS, ENC_DIM), jnp.float32).at[:N_FEATS, :].set(w_vote.T)
    wp = jnp.concatenate([w_enc_p, w_vote_tp], axis=0).astype(jnp.bfloat16)  # (512, 1024)

    b_vote_p = jnp.zeros((1, ENC_DIM), jnp.float32).at[:, :N_FEATS].set(b_vote)
    bp = jnp.concatenate([b_enc, b_vote_p], axis=0)                          # (2, 1024) f32
    return wp, bp


def consensus_net_batched(x_batch, wp, bp):
    """x_batch: (B, n_views, ...) with trailing dims flattening to 204 feats."""
    B, n_views = x_batch.shape[0], x_batch.shape[1]
    x = jnp.reshape(x_batch, (B, n_views, -1)).astype(jnp.float32)   # (B, V, 204)
    x = jnp.transpose(x, (1, 0, 2))                                  # (V, B, 204)

    b_pad = ((B + BS - 1) // BS) * BS
    xp = jnp.zeros((n_views, b_pad, PAD_FEATS), jnp.bfloat16)
    xp = xp.at[:, :B, :N_FEATS].set(x.astype(jnp.bfloat16))

    out = pl.pallas_call(
        _consensus_kernel,
        out_shape=jax.ShapeDtypeStruct((b_pad, PAD_FEATS), jnp.float32),
        grid=(b_pad // BS,),
        in_specs=[
            # per-step sample block of all views
            pl.BlockSpec((n_views, BS, PAD_FEATS), lambda b: (0, b, 0)),
            # packed weights / biases: constant block index -> resident in
            # VMEM, DMA'd once per call and reused across the whole grid
            pl.BlockSpec((2 * PAD_FEATS, ENC_DIM), lambda b: (0, 0)),
            pl.BlockSpec((2, ENC_DIM), lambda b: (0, 0)),
        ],
        out_specs=pl.BlockSpec((BS, PAD_FEATS), lambda b: (b, 0)),
        compiler_params=pltpu.CompilerParams(
            dimension_semantics=("parallel",)),   # v7x: shard batch over 2 TCs
    )(xp, wp, bp)

    return out[:B, :N_FEATS].reshape(B, 68, 3)


def consensus_net(list_x, params):
    """Original-module interface: list of (68, 3) views -> (68, 3) vote."""
    wp, bp = fold_and_pack_params(params)
    x = jnp.stack([jnp.reshape(xi, (-1,)) for xi in list_x], axis=0)[None]  # (1, V, 204)
    return consensus_net_batched(x, wp, bp)[0]


def init_params(key):
    """Deterministic init mimicking torch.nn.Linear's U(-1/sqrt(fan_in), ...)."""
    def linear(k, fan_in, fan_out):
        kw, kb = jax.random.split(k)
        bound = 1.0 / jnp.sqrt(jnp.float32(fan_in))
        w = jax.random.uniform(kw, (fan_in, fan_out), jnp.float32, -bound, bound)
        b = jax.random.uniform(kb, (1, fan_out), jnp.float32, -bound, bound)
        return w, b

    sizes = (list(zip(ENC_SIZES[:-1], ENC_SIZES[1:])) +
             list(zip(VOTE_SIZES[:-1], VOTE_SIZES[1:])))
    keys = jax.random.split(key, len(sizes))
    return [linear(k, fi, fo) for k, (fi, fo) in zip(keys, sizes)]


def _reference(list_x, params):
    """Pure-JAX reference of the same forward pass (unfolded params)."""
    x = jnp.stack([jnp.reshape(xi, (-1,)) for xi in list_x], 0).astype(jnp.float32)
    (w1, b1), (w2, b2), (w3, b3), (v1, c1), (v2, c2) = params
    h = x @ w1 + b1
    h = h @ w2 + b2
    h = h @ w3 + b3
    enc = jax.nn.sigmoid(h)
    pool = jnp.max(enc, axis=0, keepdims=True)
    v = pool @ v1 + c1
    v = v @ v2 + c2
    return jax.nn.sigmoid(v).reshape(68, 3)


if __name__ == "__main__":
    key = jax.random.PRNGKey(0)
    kp, kx = jax.random.split(key)
    params = init_params(kp)
    wp, bp = fold_and_pack_params(params)

    # Single-sample path (matches the torch module's forward signature).
    n_views = 4
    list_x = [jax.random.normal(k, (68, 3), jnp.float32)
              for k in jax.random.split(kx, n_views)]
    out = jax.block_until_ready(consensus_net(list_x, params))
    assert out.shape == (68, 3)
    ref = _reference(list_x, params)
    assert jnp.allclose(out, ref, atol=2e-2, rtol=2e-2)

    # Batched throughput path: many samples in one pallas_call, weights stay
    # resident in VMEM across grid steps.
    B = 12
    xb = jax.random.normal(jax.random.PRNGKey(1), (B, n_views, 68, 3), jnp.float32)
    outb = jax.block_until_ready(consensus_net_batched(xb, wp, bp))
    assert outb.shape == (B, 68, 3)
    refb = jnp.stack([_reference(list(xb[i]), params) for i in range(B)], 0)
    assert jnp.allclose(outb, refb, atol=2e-2, rtol=2e-2)

    print("KERNEL_OK")
</pallas_src>

<mosaic_0001>
module attributes {stable_mosaic.version = 11 : i64} {
  func.func @_consensus_kernel(%arg0: i32, %arg1: memref<4x8x256xbf16, #tpu.memory_space<vmem>>, %arg2: memref<512x1024xbf16, #tpu.memory_space<vmem>>, %arg3: memref<2x1024xf32, #tpu.memory_space<vmem>>, %arg4: memref<8x256xf32, #tpu.memory_space<vmem>>) attributes {dimension_semantics = [#tpu.dimension_semantics<parallel>], iteration_bounds = array<i64: 1>, scalar_prefetch = 0 : i64, scratch_operands = 0 : i64, tpu.core_type = #tpu.core_type<tc>, window_params = [{transform_indices = @transform_0, window_bounds = array<i64: 4, 8, 256>}, {pipeline_mode = #tpu.pipeline_mode<synchronous>, transform_indices = @transform_1, window_bounds = array<i64: 512, 1024>}, {pipeline_mode = #tpu.pipeline_mode<synchronous>, transform_indices = @transform_2, window_bounds = array<i64: 2, 1024>}, {transform_indices = @transform_3, window_bounds = array<i64: 8, 256>}]} {
    %c0 = arith.constant 0 : index
    %c0_0 = arith.constant 0 : index
    %0 = vector.load %arg2[%c0, %c0_0] : memref<512x1024xbf16, #tpu.memory_space<vmem>>, vector<256x1024xbf16>
    %c256 = arith.constant 256 : index
    %c0_1 = arith.constant 0 : index
    %1 = vector.load %arg2[%c256, %c0_1] : memref<512x1024xbf16, #tpu.memory_space<vmem>>, vector<256x1024xbf16>
    %c0_2 = arith.constant 0 : index
    %c0_3 = arith.constant 0 : index
    %2 = vector.load %arg3[%c0_2, %c0_3] : memref<2x1024xf32, #tpu.memory_space<vmem>>, vector<1x1024xf32>
    %c1 = arith.constant 1 : index
    %c0_4 = arith.constant 0 : index
    %3 = vector.load %arg3[%c1, %c0_4] : memref<2x1024xf32, #tpu.memory_space<vmem>>, vector<1x256xf32>
    %c0_5 = arith.constant 0 : index
    %c0_6 = arith.constant 0 : index
    %c0_7 = arith.constant 0 : index
    %4 = vector.load %arg1[%c0_5, %c0_6, %c0_7] : memref<4x8x256xbf16, #tpu.memory_space<vmem>>, vector<1x8x256xbf16>
    %5 = vector.shape_cast %4 : vector<1x8x256xbf16> to vector<8x256xbf16>
    %cst = arith.constant dense<0.000000e+00> : vector<8x1024xf32>
    %6 = tpu.matmul %5, %0, %cst {dimension_numbers = #tpu.dot_dimension_numbers<[1], [0], [0], [1], [0, 0, 1, 1], [], []>} : vector<8x256xbf16>, vector<256x1024xbf16>, vector<8x1024xf32> -> vector<8x1024xf32>
    %7 = vector.broadcast %2 : vector<1x1024xf32> to vector<8x1024xf32>
    %8 = arith.addf %6, %7 : vector<8x1024xf32>
    %9 = arith.negf %8 : vector<8x1024xf32>
    %10 = math.exp %9 : vector<8x1024xf32>
    %cst_8 = arith.constant 1.000000e+00 : f32
    %11 = vector.broadcast %cst_8 : f32 to vector<8x1024xf32>
    %12 = arith.addf %11, %10 : vector<8x1024xf32>
    %13 = arith.divf %11, %12 : vector<8x1024xf32>
    %c1_9 = arith.constant 1 : index
    %c0_10 = arith.constant 0 : index
    %c0_11 = arith.constant 0 : index
    %14 = vector.load %arg1[%c1_9, %c0_10, %c0_11] : memref<4x8x256xbf16, #tpu.memory_space<vmem>>, vector<1x8x256xbf16>
    %15 = vector.shape_cast %14 : vector<1x8x256xbf16> to vector<8x256xbf16>
    %cst_12 = arith.constant dense<0.000000e+00> : vector<8x1024xf32>
    %16 = tpu.matmul %15, %0, %cst_12 {dimension_numbers = #tpu.dot_dimension_numbers<[1], [0], [0], [1], [0, 0, 1, 1], [], []>} : vector<8x256xbf16>, vector<256x1024xbf16>, vector<8x1024xf32> -> vector<8x1024xf32>
    %17 = vector.broadcast %2 : vector<1x1024xf32> to vector<8x1024xf32>
    %18 = arith.addf %16, %17 : vector<8x1024xf32>
    %19 = arith.negf %18 : vector<8x1024xf32>
    %20 = math.exp %19 : vector<8x1024xf32>
    %cst_13 = arith.constant 1.000000e+00 : f32
    %21 = vector.broadcast %cst_13 : f32 to vector<8x1024xf32>
    %22 = arith.addf %21, %20 : vector<8x1024xf32>
    %23 = arith.divf %21, %22 : vector<8x1024xf32>
    %24 = arith.maximumf %13, %23 : vector<8x1024xf32>
    %c2 = arith.constant 2 : index
    %c0_14 = arith.constant 0 : index
    %c0_15 = arith.constant 0 : index
    %25 = vector.load %arg1[%c2, %c0_14, %c0_15] : memref<4x8x256xbf16, #tpu.memory_space<vmem>>, vector<1x8x256xbf16>
    %26 = vector.shape_cast %25 : vector<1x8x256xbf16> to vector<8x256xbf16>
    %cst_16 = arith.constant dense<0.000000e+00> : vector<8x1024xf32>
    %27 = tpu.matmul %26, %0, %cst_16 {dimension_numbers = #tpu.dot_dimension_numbers<[1], [0], [0], [1], [0, 0, 1, 1], [], []>} : vector<8x256xbf16>, vector<256x1024xbf16>, vector<8x1024xf32> -> vector<8x1024xf32>
    %28 = vector.broadcast %2 : vector<1x1024xf32> to vector<8x1024xf32>
    %29 = arith.addf %27, %28 : vector<8x1024xf32>
    %30 = arith.negf %29 : vector<8x1024xf32>
    %31 = math.exp %30 : vector<8x1024xf32>
    %cst_17 = arith.constant 1.000000e+00 : f32
    %32 = vector.broadcast %cst_17 : f32 to vector<8x1024xf32>
    %33 = arith.addf %32, %31 : vector<8x1024xf32>
    %34 = arith.divf %32, %33 : vector<8x1024xf32>
    %35 = arith.maximumf %24, %34 : vector<8x1024xf32>
    %c3 = arith.constant 3 : index
    %c0_18 = arith.constant 0 : index
    %c0_19 = arith.constant 0 : index
    %36 = vector.load %arg1[%c3, %c0_18, %c0_19] : memref<4x8x256xbf16, #tpu.memory_space<vmem>>, vector<1x8x256xbf16>
    %37 = vector.shape_cast %36 : vector<1x8x256xbf16> to vector<8x256xbf16>
    %cst_20 = arith.constant dense<0.000000e+00> : vector<8x1024xf32>
    %38 = tpu.matmul %37, %0, %cst_20 {dimension_numbers = #tpu.dot_dimension_numbers<[1], [0], [0], [1], [0, 0, 1, 1], [], []>} : vector<8x256xbf16>, vector<256x1024xbf16>, vector<8x1024xf32> -> vector<8x1024xf32>
    %39 = vector.broadcast %2 : vector<1x1024xf32> to vector<8x1024xf32>
    %40 = arith.addf %38, %39 : vector<8x1024xf32>
    %41 = arith.negf %40 : vector<8x1024xf32>
    %42 = math.exp %41 : vector<8x1024xf32>
    %cst_21 = arith.constant 1.000000e+00 : f32
    %43 = vector.broadcast %cst_21 : f32 to vector<8x1024xf32>
    %44 = arith.addf %43, %42 : vector<8x1024xf32>
    %45 = arith.divf %43, %44 : vector<8x1024xf32>
    %46 = arith.maximumf %35, %45 : vector<8x1024xf32>
    %47 = arith.truncf %46 : vector<8x1024xf32> to vector<8x1024xbf16>
    %cst_22 = arith.constant dense<0.000000e+00> : vector<8x256xf32>
    %48 = tpu.matmul %47, %1, %cst_22 {dimension_numbers = #tpu.dot_dimension_numbers<[1], [1], [0], [0], [0, 0, 1, 0], [], []>} : vector<8x1024xbf16>, vector<256x1024xbf16>, vector<8x256xf32> -> vector<8x256xf32>
    %49 = vector.broadcast %3 : vector<1x256xf32> to vector<8x256xf32>
    %50 = arith.addf %48, %49 : vector<8x256xf32>
    %51 = arith.negf %50 : vector<8x256xf32>
    %52 = math.exp %51 : vector<8x256xf32>
    %cst_23 = arith.constant 1.000000e+00 : f32
    %53 = vector.broadcast %cst_23 : f32 to vector<8x256xf32>
    %54 = arith.addf %53, %52 : vector<8x256xf32>
    %55 = arith.divf %53, %54 : vector<8x256xf32>
    %c0_24 = arith.constant 0 : index
    %c0_25 = arith.constant 0 : index
    %56 = vector.load %arg4[%c0_24, %c0_25] : memref<8x256xf32, #tpu.memory_space<vmem>>, vector<8x256xf32>
    tpu.vector_store %arg4[%c0_24, %c0_25], %55 {strides = array<i32>} : memref<8x256xf32, #tpu.memory_space<vmem>>, vector<8x256xf32>,
    return
  }
  func.func @transform_0(%arg0: i32) -> (i32, i32, i32) {
    %c0_i32 = arith.constant 0 : i32
    %c0_i32_0 = arith.constant 0 : i32
    %c0_i32_1 = arith.constant 0 : i32
    return %c0_i32, %arg0, %c0_i32_0 : i32, i32, i32
  }
  func.func @transform_1(%arg0: i32) -> (i32, i32) {
    %c0_i32 = arith.constant 0 : i32
    %c0_i32_0 = arith.constant 0 : i32
    %c0_i32_1 = arith.constant 0 : i32
    return %c0_i32, %c0_i32_0 : i32, i32
  }
  func.func @transform_2(%arg0: i32) -> (i32, i32) {
    %c0_i32 = arith.constant 0 : i32
    %c0_i32_0 = arith.constant 0 : i32
    %c0_i32_1 = arith.constant 0 : i32
    return %c0_i32, %c0_i32_0 : i32, i32
  }
  func.func @transform_3(%arg0: i32) -> (i32, i32) {
    %c0_i32 = arith.constant 0 : i32
    %c0_i32_0 = arith.constant 0 : i32
    return %arg0, %c0_i32 : i32, i32
  }
}

</mosaic_0001>

<bundles_post_ra>
// kernel: tpu_custom_call.1
= control target key start
LH: loop header
LB: loop body
LE: loop exit
PB: predicated region body
PF: predicated region fallthrough
CT: control target
= control target key end

     0   :  { %8 = vsyncpa [#allocation3], 0  ;;  %s4390_s0 = inlined_call_operand.hbm [shape: bf16[4,8,256], index: 0, kind: input, shape index: {}]   ;;  %s4391_s1 = inlined_call_operand.hbm [shape: bf16[512,1024], index: 1, kind: input, shape index: {}]   ;;  %s4392_s2 = inlined_call_operand.hbm [shape: f32[2,1024], index: 2, kind: input, shape index: {}]   ;;  %s4393_s3 = inlined_call_operand.hbm [shape: f32[8,256], index: 3, kind: output, shape index: {}]  }
   0x1   :  { %9 = vsyncpa [#allocation6], 0 }
   0x2   :  { %10 = vsyncpa [#allocation4], 0  ;;  %s3290_s12 = smov [#allocation5]  }
   0x3   :  { %s28_s13 = sshll.u32 %s3290_s12, 4  ;;  %s29_s13 = int_to_ptr.vmem [resolvable:$true] %s28_s13 }
   0x4   :  { %s3212_s14 = scalar_lea.vmem %s29_s13, 32768  ;;  %p3217_p1 = scmp.lt.s32.totalorder %s29_s13, %s29_s13 }
   0x5   :  { %p3213_p0 = scmp.ne.s32.totalorder %s29_s13, %s3212_s14  ;;  %p3218_p2 = scmp.lt.s32.totalorder %s3212_s14, %s3212_s14 }
   0x7   :  { %p3219_p3 = por %p3218_p2, %p3217_p1 }
   0x9   :  { %p3220_p4 = pnand %p3219_p3, %p3213_p0 }
   0xb   :  { %3223 = shalt.err (!%p3220_p4)
}
   0xc   :  { %s3291_s15 = smov 512   ;;  %s3292_s16 = smov 32  }
   0xd   :  { %34 = dma.hbm_to_vmem [thread:$0]  %s4391_s1, 32768, %s29_s13, [#allocation6], %s3291_s15, %s3291_s15, %s3292_s16  }
   0xe   :  { %s3293_s19 = smov [#allocation2]  }
   0xf   :  { %s16_s20 = sshll.u32 %s3293_s19, 4  ;;  %s17_s20 = int_to_ptr.vmem [resolvable:$true] %s16_s20 }
  0x10   :  { %s3232_s21 = scalar_lea.vmem %s17_s20, 512  ;;  %p3237_p6 = scmp.lt.s32.totalorder %s17_s20, %s17_s20 }
  0x11   :  { %p3233_p5 = scmp.ne.s32.totalorder %s17_s20, %s3232_s21  ;;  %p3238_p7 = scmp.lt.s32.totalorder %s3232_s21, %s3232_s21 }
  0x13   :  { %p3239_p8 = por %p3238_p7, %p3237_p6 }
  0x15   :  { %p3240_p9 = pnand %p3239_p8, %p3233_p5 }
  0x17   :  { %3243 = shalt.err (!%p3240_p9)
}
  0x18   :  { %s3294_s22 = smov 128   ;;  %s3295_s23 = smov 8  }
  0x19   :  { %22 = dma.hbm_to_vmem [thread:$0]  %s4390_s0, 512, %s17_s20, [#allocation3], %s3294_s22, %s3294_s22, %s3295_s23  }
  0x1a   :  { %s3296_s26 = smov [#allocation7]  }
  0x1b   :  { %s41_s27 = sshll.u32 %s3296_s26, 4  ;;  %s42_s27 = int_to_ptr.vmem [resolvable:$true] %s41_s27 }
  0x1c   :  { %s3252_s1 = scalar_lea.vmem %s42_s27, 256  ;;  %p3257_p11 = scmp.lt.s32.totalorder %s42_s27, %s42_s27 }
  0x1d   :  { %p3253_p10 = scmp.ne.s32.totalorder %s42_s27, %s3252_s1  ;;  %p3258_p12 = scmp.lt.s32.totalorder %s3252_s1, %s3252_s1 }
  0x1f   :  { %p3259_p13 = por %p3258_p12, %p3257_p11 }
  0x21   :  { %p3260_p0 = pnand %p3259_p13, %p3253_p10 }
  0x23   :  { %3263 = shalt.err (!%p3260_p0)
}
  0x24   :  { %44 = dma.hbm_to_vmem [thread:$0]  %s4392_s2, 256, %s42_s27, [#allocation6]  }
  0x25   :  { %3284 = dma.done.wait [#allocation3], 512  }
  0x26   :  { %3285 = vsyncadd [#allocation3], 4294966784 }
  0x27   :  { %3286 = dma.done.wait [#allocation6], 33024  }
  0x28   :  { %3287 = vsyncadd [#allocation6], 4294934272  ;;  %v110_v0 = vld [vmem:[#allocation5 + $0x1c0] sm:$0xff]  ;;  %v111_v2 = vld [vmem:[#allocation5 + $0x1c8] sm:$0xff]  ;;  %s3297_s0 = smov [#allocation8]  }
  0x29   :  { %v114_v1 = vld [vmem:[#allocation5 + $0x1e0] sm:$0xff]  ;;  %v115_v4 = vld [vmem:[#allocation5 + $0x1e8] sm:$0xff]  ;;  %s2744_s2 = sshll.u32 %s3297_s0, 4  ;;  %s2745_s2 = int_to_ptr.vmem [resolvable:$true] %s2744_s2 }
  0x2a   :  { %v3327_v3 = vcombine.high %v110_v0, %v114_v1  ;;  %v3329_v5 = vcombine.low %v110_v0, %v114_v1  ;;  %v102_v6 = vld [vmem:[#allocation5 + $0x180] sm:$0xff]  ;;  %v3331_v8 = vcombine.high %v111_v2, %v115_v4  ;;  %v3333_v9 = vcombine.low %v111_v2, %v115_v4  ;;  %v103_v11 = vld [vmem:[#allocation5 + $0x188] sm:$0xff]  ;;  %s3264_s30 = scalar_lea.vmem %s2745_s2, 256  ;;  %p3269_p2 = scmp.lt.s32.totalorder %s2745_s2, %s2745_s2 }
  0x2b   :  { %v106_v7 = vld [vmem:[#allocation5 + $0x1a0] sm:$0xff]  ;;  %v107_v12 = vld [vmem:[#allocation5 + $0x1a8] sm:$0xff]  ;;  %p3265_p1 = scmp.ne.s32.totalorder %s2745_s2, %s3264_s30  ;;  %p3270_p3 = scmp.lt.s32.totalorder %s3264_s30, %s3264_s30 }
  0x2c   :  { %4589 = vst [vmem:[#allocation12_spill] sm:$0xff] %v3327_v3  ;;  %4590 = vst [vmem:[#allocation13_spill] sm:$0xff] %v3331_v8  ;;  %v3335_v10 = vcombine.high %v102_v6, %v106_v7  ;;  %v94_v13 = vld [vmem:[#allocation5 + $0x140] sm:$0xff]  ;;  %1002 = vmatprep.subr.bf16.mxu0 %v3327_v3  ;;  %v3338_v14 = vcombine.high %v103_v11, %v107_v12  ;;  %v95_v16 = vld [vmem:[#allocation5 + $0x148] sm:$0xff]  ;;  %1043 = vmatprep.subr.bf16.mxu1 %v3331_v8 }
  0x2d   :  { %4591 = vst [vmem:[#allocation14_spill] sm:$0xff] %v3333_v9  ;;  %v98_v15 = vld [vmem:[#allocation5 + $0x160] sm:$0xff]  ;;  %v99_v17 = vld [vmem:[#allocation5 + $0x168] sm:$0xff]  ;;  %1003 = vmatpush1.bf16.msra.mxu0 %v3329_v5  ;;  %v3342_v18 = vcombine.low %v102_v6, %v106_v7  ;;  %1044 = vmatpush1.bf16.msra.mxu1 %v3333_v9  ;;  %v3346_v19 = vcombine.low %v103_v11, %v107_v12  ;;  %p3271_p4 = por %p3270_p3, %p3269_p2 }
  0x2e   :  { %1004 = vmatprep.subr.bf16.mxu0 %v3335_v10  ;;  %v3348_v20 = vcombine.high %v94_v13, %v98_v15  ;;  %1045 = vmatprep.subr.bf16.mxu1 %v3338_v14  ;;  %v3351_v21 = vcombine.high %v95_v16, %v99_v17  ;;  %v86_v22 = vld [vmem:[#allocation5 + $0x100] sm:$0xff]  ;;  %v87_v24 = vld [vmem:[#allocation5 + $0x108] sm:$0xff]  ;;  %v3354_v26 = vcombine.low %v94_v13, %v98_v15 }
  0x2f   :  { %v90_v23 = vld [vmem:[#allocation5 + $0x120] sm:$0xff]  ;;  %v91_v25 = vld [vmem:[#allocation5 + $0x128] sm:$0xff]  ;;  %v3358_v27 = vcombine.low %v95_v16, %v99_v17  ;;  %p3272_p5 = pnand %p3271_p4, %p3265_p1 }
  0x30   :  { %v3360_v28 = vcombine.high %v86_v22, %v90_v23  ;;  %v3363_v29 = vcombine.high %v87_v24, %v91_v25  ;;  %v78_v30 = vld [vmem:[#allocation5 + $0xc0] sm:$0xff]  ;;  %v79_v32 = vld [vmem:[#allocation5 + $0xc8] sm:$0xff]  ;;  %v3366_v34 = vcombine.low %v86_v22, %v90_v23  ;;  %v3370_v35 = vcombine.low %v87_v24, %v91_v25 }
  0x31   :  { %1005 = vmatpush1.bf16.msra.mxu0 %v3342_v18  ;;  %1046 = vmatpush1.bf16.msra.mxu1 %v3346_v19  ;;  %v82_v31 = vld [vmem:[#allocation5 + $0xe0] sm:$0xff]  ;;  %v83_v33 = vld [vmem:[#allocation5 + $0xe8] sm:$0xff] }
  0x32   :  { %1006 = vmatprep.subr.bf16.mxu0 %v3348_v20  ;;  %1047 = vmatprep.subr.bf16.mxu1 %v3351_v21  ;;  %v3372_v36 = vcombine.high %v78_v30, %v82_v31  ;;  %v3375_v37 = vcombine.high %v79_v32, %v83_v33  ;;  %v70_v38 = vld [vmem:[#allocation5 + $0x80] sm:$0xff]  ;;  %v71_v40 = vld [vmem:[#allocation5 + $0x88] sm:$0xff]  ;;  %v3378_v42 = vcombine.low %v78_v30, %v82_v31 }
  0x33   :  { %v74_v39 = vld [vmem:[#allocation5 + $0xa0] sm:$0xff]  ;;  %v75_v41 = vld [vmem:[#allocation5 + $0xa8] sm:$0xff]  ;;  %v3382_v43 = vcombine.low %v79_v32, %v83_v33 }
  0x34   :  { %v3384_v44 = vcombine.high %v70_v38, %v74_v39  ;;  %v3387_v45 = vcombine.high %v71_v40, %v75_v41  ;;  %v62_v46 = vld [vmem:[#allocation5 + $0x40] sm:$0xff]  ;;  %v63_v48 = vld [vmem:[#allocation5 + $0x48] sm:$0xff]  ;;  %v3390_v50 = vcombine.low %v70_v38, %v74_v39  ;;  %v3394_v51 = vcombine.low %v71_v40, %v75_v41 }
  0x35   :  { %1007 = vmatpush1.bf16.msra.mxu0 %v3354_v26  ;;  %1048 = vmatpush1.bf16.msra.mxu1 %v3358_v27  ;;  %v66_v47 = vld [vmem:[#allocation5 + $0x60] sm:$0xff]  ;;  %v67_v49 = vld [vmem:[#allocation5 + $0x68] sm:$0xff] }
  0x36   :  { %1008 = vmatprep.subr.bf16.mxu0 %v3360_v28  ;;  %1049 = vmatprep.subr.bf16.mxu1 %v3363_v29  ;;  %v3396_v52 = vcombine.high %v62_v46, %v66_v47  ;;  %v3398_v53 = vld [vmem:[#allocation2] sm:$0xff]  ;;  %v3401_v54 = vcombine.high %v63_v48, %v67_v49  ;;  %v55_v58 = vld [vmem:[#allocation5 + $0x8] sm:$0xff]  ;;  %v3408_v60 = vcombine.low %v62_v46, %v66_v47 }
  0x37   :  { %v54_v55 = vld [vmem:[#allocation5] sm:$0xff]  ;;  %v3405_v57 = vcombine.high %v3398_v53, %v3398_v53  ;;  %v59_v59 = vld [vmem:[#allocation5 + $0x28] sm:$0xff]  ;;  %v3413_v61 = vcombine.low %v63_v48, %v67_v49 }
  0x38   :  { %v58_v56 = vld [vmem:[#allocation5 + $0x20] sm:$0xff]  ;;  %v3418_v63 = vcombine.high %v55_v58, %v59_v59  ;;  %v175_v2 = vld [vmem:[#allocation5 + $0x3c8] sm:$0xff]  ;;  %v3426_v7 = vcombine.low %v55_v58, %v59_v59 }
  0x39   :  { %1009 = vmatpush1.bf16.msra.mxu0 %v3366_v34  ;;  %1050 = vmatpush1.bf16.msra.mxu1 %v3370_v35  ;;  %v3415_v62 = vcombine.high %v54_v55, %v58_v56  ;;  %v174_v0 = vld [vmem:[#allocation5 + $0x3c0] sm:$0xff]  ;;  %v179_v4 = vld [vmem:[#allocation5 + $0x3e8] sm:$0xff]  ;;  %v3422_v6 = vcombine.low %v54_v55, %v58_v56 }
  0x3a   :  { %1010 = vmatprep.subr.bf16.mxu0 %v3372_v36  ;;  %1051 = vmatprep.subr.bf16.mxu1 %v3375_v37  ;;  %v178_v1 = vld [vmem:[#allocation5 + $0x3e0] sm:$0xff]  ;;  %4593 = vst [vmem:[#allocation16_spill] sm:$0xff] %v3426_v7  ;;  %v3431_v12 = vcombine.high %v175_v2, %v179_v4  ;;  %v167_v16 = vld [vmem:[#allocation5 + $0x388] sm:$0xff]  ;;  %v3438_v23 = vcombine.low %v175_v2, %v179_v4 }
  0x3b   :  { %1034 = vmatprep.mubr.bf16.mxu0 %v3405_v57  ;;  %1075 = vmatprep.mubr.bf16.mxu1 %v3405_v57  ;;  %4592 = vst [vmem:[#allocation15_spill] sm:$0xff] %v3422_v6  ;;  %v3428_v11 = vcombine.high %v174_v0, %v178_v1  ;;  %v166_v13 = vld [vmem:[#allocation5 + $0x380] sm:$0xff]  ;;  %v171_v17 = vld [vmem:[#allocation5 + $0x3a8] sm:$0xff]  ;;  %v3434_v22 = vcombine.low %v174_v0, %v178_v1 }
  0x3c   :  { %4594 = vst [vmem:[#allocation17_spill] sm:$0xff] %v3431_v12  ;;  %v170_v15 = vld [vmem:[#allocation5 + $0x3a0] sm:$0xff]  ;;  %4596 = vst [vmem:[#allocation19_spill] sm:$0xff] %v3438_v23  ;;  %v3443_v25 = vcombine.high %v167_v16, %v171_v17  ;;  %v159_v32 = vld [vmem:[#allocation5 + $0x348] sm:$0xff]  ;;  %v3450_v39 = vcombine.low %v167_v16, %v171_v17 }
  0x3d   :  { %1011 = vmatpush1.bf16.msra.mxu0 %v3378_v42  ;;  %1052 = vmatpush1.bf16.msra.mxu1 %v3382_v43  ;;  %4595 = vst [vmem:[#allocation18_spill] sm:$0xff] %v3434_v22  ;;  %v3440_v24 = vcombine.high %v166_v13, %v170_v15  ;;  %v158_v30 = vld [vmem:[#allocation5 + $0x340] sm:$0xff]  ;;  %v163_v33 = vld [vmem:[#allocation5 + $0x368] sm:$0xff]  ;;  %v3446_v38 = vcombine.low %v166_v13, %v170_v15 }
  0x3e   :  { %1012 = vmatprep.subr.bf16.mxu0 %v3384_v44  ;;  %1053 = vmatprep.subr.bf16.mxu1 %v3387_v45  ;;  %4598 = vst [vmem:[#allocation21_spill] sm:$0xff] %v3443_v25  ;;  %v162_v31 = vld [vmem:[#allocation5 + $0x360] sm:$0xff]  ;;  %4600 = vst [vmem:[#allocation23_spill] sm:$0xff] %v3450_v39  ;;  %v3455_v41 = vcombine.high %v159_v32, %v163_v33  ;;  %v151_v48 = vld [vmem:[#allocation5 + $0x308] sm:$0xff]  ;;  %v3462_v56 = vcombine.low %v159_v32, %v163_v33 }
  0x3f   :  { %4597 = vst [vmem:[#allocation20_spill] sm:$0xff] %v3440_v24  ;;  %4599 = vst [vmem:[#allocation22_spill] sm:$0xff] %v3446_v38  ;;  %v3452_v40 = vcombine.high %v158_v30, %v162_v31  ;;  %v150_v46 = vld [vmem:[#allocation5 + $0x300] sm:$0xff]  ;;  %v155_v49 = vld [vmem:[#allocation5 + $0x328] sm:$0xff]  ;;  %v3458_v55 = vcombine.low %v158_v30, %v162_v31 }
  0x40   :  { %4602 = vst [vmem:[#allocation25_spill] sm:$0xff] %v3455_v41  ;;  %v154_v47 = vld [vmem:[#allocation5 + $0x320] sm:$0xff]  ;;  %4604 = vst [vmem:[#allocation27_spill] sm:$0xff] %v3462_v56  ;;  %v3467_v59 = vcombine.high %v151_v48, %v155_v49  ;;  %v143_v2 = vld [vmem:[#allocation5 + $0x2c8] sm:$0xff]  ;;  %v3474_v15 = vcombine.low %v151_v48, %v155_v49 }
  0x41   :  { %1013 = vmatpush1.bf16.msra.mxu0 %v3390_v50  ;;  %1054 = vmatpush1.bf16.msra.mxu1 %v3394_v51  ;;  %4601 = vst [vmem:[#allocation24_spill] sm:$0xff] %v3452_v40  ;;  %4603 = vst [vmem:[#allocation26_spill] sm:$0xff] %v3458_v55  ;;  %v3464_v58 = vcombine.high %v150_v46, %v154_v47  ;;  %v142_v0 = vld [vmem:[#allocation5 + $0x2c0] sm:$0xff]  ;;  %v147_v4 = vld [vmem:[#allocation5 + $0x2e8] sm:$0xff]  ;;  %v3470_v13 = vcombine.low %v150_v46, %v154_v47 }
  0x42   :  { %1014 = vmatprep.subr.bf16.mxu0 %v3396_v52  ;;  %1055 = vmatprep.subr.bf16.mxu1 %v3401_v54  ;;  %4606 = vst [vmem:[#allocation29_spill] sm:$0xff] %v3467_v59  ;;  %v146_v1 = vld [vmem:[#allocation5 + $0x2e0] sm:$0xff]  ;;  %4608 = vst [vmem:[#allocation31_spill] sm:$0xff] %v3474_v15  ;;  %v3479_v17 = vcombine.high %v143_v2, %v147_v4  ;;  %v135_v32 = vld [vmem:[#allocation5 + $0x288] sm:$0xff]  ;;  %v3486_v47 = vcombine.low %v143_v2, %v147_v4 }
  0x43   :  { %4605 = vst [vmem:[#allocation28_spill] sm:$0xff] %v3464_v58  ;;  %4607 = vst [vmem:[#allocation30_spill] sm:$0xff] %v3470_v13  ;;  %v3476_v16 = vcombine.high %v142_v0, %v146_v1  ;;  %v134_v30 = vld [vmem:[#allocation5 + $0x280] sm:$0xff]  ;;  %v139_v33 = vld [vmem:[#allocation5 + $0x2a8] sm:$0xff]  ;;  %v3482_v46 = vcombine.low %v142_v0, %v146_v1 }
  0x44   :  { %4610 = vst [vmem:[#allocation33_spill] sm:$0xff] %v3479_v17  ;;  %v138_v31 = vld [vmem:[#allocation5 + $0x2a0] sm:$0xff]  ;;  %4612 = vst [vmem:[#allocation35_spill] sm:$0xff] %v3486_v47  ;;  %v3491_v49 = vcombine.high %v135_v32, %v139_v33  ;;  %v3498_v1 = vcombine.low %v135_v32, %v139_v33 }
  0x45   :  { %1015 = vmatpush1.bf16.msra.mxu0 %v3408_v60  ;;  %1056 = vmatpush1.bf16.msra.mxu1 %v3413_v61  ;;  %4609 = vst [vmem:[#allocation32_spill] sm:$0xff] %v3476_v16  ;;  %4611 = vst [vmem:[#allocation34_spill] sm:$0xff] %v3482_v46  ;;  %v3488_v48 = vcombine.high %v134_v30, %v138_v31  ;;  %v3494_v0 = vcombine.low %v134_v30, %v138_v31 }
  0x46   :  { %1016 = vmatprep.subr.bf16.mxu0 %v3415_v62  ;;  %1057 = vmatprep.subr.bf16.mxu1 %v3418_v63  ;;  %4614 = vst [vmem:[#allocation37_spill] sm:$0xff] %v3491_v49  ;;  %4616 = vst [vmem:[#allocation39_spill] sm:$0xff] %v3498_v1 }
  0x47   :  { %4613 = vst [vmem:[#allocation36_spill] sm:$0xff] %v3488_v48  ;;  %4615 = vst [vmem:[#allocation38_spill] sm:$0xff] %v3494_v0 }
  0x49   :  { %1017 = vmatpush1.bf16.msra.mxu0 %v3422_v6  ;;  %1058 = vmatpush1.bf16.msra.mxu1 %v3426_v7 }
  0x4a   :  { %1018 = vmatprep.subr.bf16.mxu0 %v3428_v11  ;;  %1059 = vmatprep.subr.bf16.mxu1 %v3431_v12 }
  0x4d   :  { %1019 = vmatpush2.bf16.msra.mxu0 %v3434_v22  ;;  %1060 = vmatpush2.bf16.msra.mxu1 %v3438_v23 }
  0x4e   :  { %1020 = vmatprep.subr.bf16.mxu0 %v3440_v24  ;;  %1061 = vmatprep.subr.bf16.mxu1 %v3443_v25 }
  0x51   :  { %1021 = vmatpush2.bf16.msra.mxu0 %v3446_v38  ;;  %1062 = vmatpush2.bf16.msra.mxu1 %v3450_v39 }
  0x52   :  { %1022 = vmatprep.subr.bf16.mxu0 %v3452_v40  ;;  %1063 = vmatprep.subr.bf16.mxu1 %v3455_v41 }
  0x55   :  { %1023 = vmatpush2.bf16.msra.mxu0 %v3458_v55  ;;  %1064 = vmatpush2.bf16.msra.mxu1 %v3462_v56  ;;  %v127_v56 = vld [vmem:[#allocation5 + $0x248] sm:$0xff] }
  0x56   :  { %1024 = vmatprep.subr.bf16.mxu0 %v3464_v58  ;;  %1065 = vmatprep.subr.bf16.mxu1 %v3467_v59  ;;  %v126_v59 = vld [vmem:[#allocation5 + $0x240] sm:$0xff]  ;;  %v131_v55 = vld [vmem:[#allocation5 + $0x268] sm:$0xff] }
  0x57   :  { %v130_v58 = vld [vmem:[#allocation5 + $0x260] sm:$0xff]  ;;  %v3503_v4 = vcombine.high %v127_v56, %v131_v55  ;;  %v3510_v31 = vcombine.low %v127_v56, %v131_v55 }
  0x58   :  { %v3500_v2 = vcombine.high %v126_v59, %v130_v58  ;;  %v3506_v30 = vcombine.low %v126_v59, %v130_v58 }
  0x59   :  { %1025 = vmatpush2.bf16.msra.mxu0 %v3470_v13  ;;  %1066 = vmatpush2.bf16.msra.mxu1 %v3474_v15  ;;  %4618 = vst [vmem:[#allocation41_spill] sm:$0xff] %v3503_v4  ;;  %v119_v15 = vld [vmem:[#allocation5 + $0x208] sm:$0xff]  ;;  %4620 = vst [vmem:[#allocation43_spill] sm:$0xff] %v3510_v31 }
  0x5a   :  { %1026 = vmatprep.subr.bf16.mxu0 %v3476_v16  ;;  %1067 = vmatprep.subr.bf16.mxu1 %v3479_v17  ;;  %4617 = vst [vmem:[#allocation40_spill] sm:$0xff] %v3500_v2  ;;  %v118_v17 = vld [vmem:[#allocation5 + $0x200] sm:$0xff]  ;;  %v123_v13 = vld [vmem:[#allocation5 + $0x228] sm:$0xff]  ;;  %4619 = vst [vmem:[#allocation42_spill] sm:$0xff] %v3506_v30 }
  0x5b   :  { %v122_v16 = vld [vmem:[#allocation5 + $0x220] sm:$0xff]  ;;  %v3515_v33 = vcombine.high %v119_v15, %v123_v13  ;;  %v3522_v55 = vcombine.low %v119_v15, %v123_v13 }
  0x5c   :  { %v3512_v32 = vcombine.high %v118_v17, %v122_v16  ;;  %v3518_v58 = vcombine.low %v118_v17, %v122_v16  ;;  %v105_v16 = vld [vmem:[#allocation5 + $0x198] sm:$0xff] }
  0x5d   :  { %1027 = vmatpush2.bf16.msra.mxu0 %v3482_v46  ;;  %1068 = vmatpush2.bf16.msra.mxu1 %v3486_v47  ;;  %4622 = vst [vmem:[#allocation45_spill] sm:$0xff] %v3515_v33  ;;  %v113_v47 = vld [vmem:[#allocation5 + $0x1d8] sm:$0xff]  ;;  %4624 = vst [vmem:[#allocation47_spill] sm:$0xff] %v3522_v55 }
  0x5e   :  { %1028 = vmatprep.subr.bf16.mxu0 %v3488_v48  ;;  %1069 = vmatprep.subr.bf16.mxu1 %v3491_v49  ;;  %4621 = vst [vmem:[#allocation44_spill] sm:$0xff] %v3512_v32  ;;  %v112_v49 = vld [vmem:[#allocation5 + $0x1d0] sm:$0xff]  ;;  %v117_v46 = vld [vmem:[#allocation5 + $0x1f8] sm:$0xff]  ;;  %4623 = vst [vmem:[#allocation46_spill] sm:$0xff] %v3518_v58 }
  0x5f   :  { %v116_v48 = vld [vmem:[#allocation5 + $0x1f0] sm:$0xff]  ;;  %v3527_v59 = vcombine.high %v113_v47, %v117_v46  ;;  %v109_v17 = vld [vmem:[#allocation5 + $0x1b8] sm:$0xff]  ;;  %v3538_v13 = vcombine.low %v113_v47, %v117_v46 }
  0x60   :  { %v3524_v56 = vcombine.high %v112_v49, %v116_v48  ;;  %v3552_v46 = vcombine.low %v105_v16, %v109_v17 }
  0x61   :  { %1029 = vmatpush2.bf16.msra.mxu0 %v3494_v0  ;;  %1070 = vmatpush2.bf16.msra.mxu1 %v3498_v1  ;;  %4626 = vst [vmem:[#allocation49_spill] sm:$0xff] %v3527_v59  ;;  %v3531_v1 = vcombine.low %v3398_v53, %v3398_v53  ;;  %4628 = vst [vmem:[#allocation51_spill] sm:$0xff] %v3538_v13  ;;  %v96_v53 = vld [vmem:[#allocation5 + $0x150] sm:$0xff] }
  0x62   :  { %1030 = vmatprep.subr.bf16.mxu0 %v3500_v2  ;;  %1071 = vmatprep.subr.bf16.mxu1 %v3503_v4  ;;  %4625 = vst [vmem:[#allocation48_spill] sm:$0xff] %v3524_v56  ;;  %v104_v4 = vld [vmem:[#allocation5 + $0x190] sm:$0xff]  ;;  %4632 = vst [vmem:[#allocation55_spill] sm:$0xff] %v3552_v46 }
  0x63   :  { %v108_v2 = vld [vmem:[#allocation5 + $0x1b0] sm:$0xff] }
  0x64   :  { %v3540_v15 = vcombine.high %v104_v4, %v108_v2 }
  0x65   :  { %1031 = vmatpush2.bf16.msra.mxu0 %v3506_v30  ;;  %1072 = vmatpush2.bf16.msra.mxu1 %v3510_v31  ;;  %v3534_v31 = vcombine.low %v112_v49, %v116_v48  ;;  %v97_v30 = vld [vmem:[#allocation5 + $0x158] sm:$0xff]  ;;  %v3548_v48 = vcombine.low %v104_v4, %v108_v2 }
  0x66   :  { %1032 = vmatprep.subr.bf16.mxu0 %v3512_v32  ;;  %1073 = vmatprep.subr.bf16.mxu1 %v3515_v33  ;;  %4629 = vst [vmem:[#allocation52_spill] sm:$0xff] %v3540_v15  ;;  %v3543_v33 = vcombine.high %v105_v16, %v109_v17  ;;  %v100_v32 = vld [vmem:[#allocation5 + $0x170] sm:$0xff] }
  0x67   :  { %4627 = vst [vmem:[#allocation50_spill] sm:$0xff] %v3534_v31  ;;  %4631 = vst [vmem:[#allocation54_spill] sm:$0xff] %v3548_v48  ;;  %v3554_v47 = vcombine.high %v96_v53, %v100_v32  ;;  %v3562_v2 = vcombine.low %v96_v53, %v100_v32 }
  0x68   :  { %4630 = vst [vmem:[#allocation53_spill] sm:$0xff] %v3543_v33 }
  0x69   :  { %1033 = vmatpush2.bf16.msra.mxu0 %v3518_v58  ;;  %1074 = vmatpush2.bf16.msra.mxu1 %v3522_v55  ;;  %v101_v58 = vld [vmem:[#allocation5 + $0x178] sm:$0xff]  ;;  %4633 = vst [vmem:[#allocation56_spill] sm:$0xff] %v3554_v47  ;;  %4635 = vst [vmem:[#allocation58_spill] sm:$0xff] %v3562_v2 }
  0x6a   :  { %1084 = vmatprep.subr.bf16.mxu0 %v3524_v56  ;;  %1125 = vmatprep.subr.bf16.mxu1 %v3527_v59  ;;  %v3557_v49 = vcombine.high %v97_v30, %v101_v58  ;;  %v88_v59 = vld [vmem:[#allocation5 + $0x110] sm:$0xff]  ;;  %v89_v55 = vld [vmem:[#allocation5 + $0x118] sm:$0xff]  ;;  %v3566_v4 = vcombine.low %v97_v30, %v101_v58 }
  0x6b   :  { %v92_v56 = vld [vmem:[#allocation5 + $0x130] sm:$0xff] }
  0x6c   :  { %1035 = vmatmul.mubr.bf16.vlgmr.msra.gmra.mxu0 %v3531_v1  ;;  %1076 = vmatmul.mubr.bf16.vlgmr.msra.gmra.mxu1 %v3531_v1  ;;  %4634 = vst [vmem:[#allocation57_spill] sm:$0xff] %v3557_v49  ;;  %4636 = vst [vmem:[#allocation59_spill] sm:$0xff] %v3566_v4  ;;  %v3568_v16 = vcombine.high %v88_v59, %v92_v56  ;;  %v3574_v32 = vcombine.low %v88_v59, %v92_v56 }
  0x6d   :  { %1085 = vmatpush1.bf16.msra.mxu0 %v3534_v31  ;;  %1126 = vmatpush1.bf16.msra.mxu1 %v3538_v13  ;;  %v93_v31 = vld [vmem:[#allocation5 + $0x138] sm:$0xff] }
  0x6e   :  { %1086 = vmatprep.subr.bf16.mxu0 %v3540_v15  ;;  %1127 = vmatprep.subr.bf16.mxu1 %v3543_v33  ;;  %4637 = vst [vmem:[#allocation60_spill] sm:$0xff] %v3568_v16  ;;  %v3571_v17 = vcombine.high %v89_v55, %v93_v31  ;;  %v80_v33 = vld [vmem:[#allocation5 + $0xd0] sm:$0xff]  ;;  %v81_v13 = vld [vmem:[#allocation5 + $0xd8] sm:$0xff]  ;;  %4639 = vst [vmem:[#allocation62_spill] sm:$0xff] %v3574_v32  ;;  %v3578_v30 = vcombine.low %v89_v55, %v93_v31 }
  0x6f   :  { %1116 = vmatprep.mubr.bf16.mxu0 %v3405_v57  ;;  %1157 = vmatprep.mubr.bf16.mxu1 %v3405_v57  ;;  %v84_v15 = vld [vmem:[#allocation5 + $0xf0] sm:$0xff]  ;;  %v85_v57 = vld [vmem:[#allocation5 + $0xf8] sm:$0xff] }
  0x70   :  { %4638 = vst [vmem:[#allocation61_spill] sm:$0xff] %v3571_v17  ;;  %4640 = vst [vmem:[#allocation63_spill] sm:$0xff] %v3578_v30  ;;  %v3580_v58 = vcombine.high %v80_v33, %v84_v15  ;;  %v3583_v53 = vcombine.high %v81_v13, %v85_v57  ;;  %v3586_v56 = vcombine.low %v80_v33, %v84_v15 }
  0x71   :  { %1087 = vmatpush1.bf16.msra.mxu0 %v3548_v48  ;;  %1128 = vmatpush1.bf16.msra.mxu1 %v3552_v46  ;;  %v73_v46 = vld [vmem:[#allocation5 + $0x98] sm:$0xff]  ;;  %v3590_v31 = vcombine.low %v81_v13, %v85_v57 }
  0x72   :  { %1088 = vmatprep.subr.bf16.mxu0 %v3554_v47  ;;  %1129 = vmatprep.subr.bf16.mxu1 %v3557_v49  ;;  %4641 = vst [vmem:[#allocation64_spill] sm:$0xff] %v3580_v58  ;;  %4642 = vst [vmem:[#allocation65_spill] sm:$0xff] %v3583_v53  ;;  %v72_v49 = vld [vmem:[#allocation5 + $0x90] sm:$0xff]  ;;  %v77_v48 = vld [vmem:[#allocation5 + $0xb8] sm:$0xff] }
  0x73   :  { %v76_v47 = vld [vmem:[#allocation5 + $0xb0] sm:$0xff]  ;;  %4643 = vst [vmem:[#allocation66_spill] sm:$0xff] %v3586_v56  ;;  %4644 = vst [vmem:[#allocation67_spill] sm:$0xff] %v3590_v31  ;;  %v3595_v59 = vcombine.high %v73_v46, %v77_v48  ;;  %v3602_v13 = vcombine.low %v73_v46, %v77_v48 }
  0x74   :  { %v3592_v55 = vcombine.high %v72_v49, %v76_v47  ;;  %v3598_v33 = vcombine.low %v72_v49, %v76_v47 }
  0x75   :  { %1089 = vmatpush1.bf16.msra.mxu0 %v3562_v2  ;;  %1130 = vmatpush1.bf16.msra.mxu1 %v3566_v4  ;;  %4646 = vst [vmem:[#allocation69_spill] sm:$0xff] %v3595_v59  ;;  %v65_v4 = vld [vmem:[#allocation5 + $0x58] sm:$0xff]  ;;  %4648 = vst [vmem:[#allocation71_spill] sm:$0xff] %v3602_v13 }
  0x76   :  { %1090 = vmatprep.subr.bf16.mxu0 %v3568_v16  ;;  %1131 = vmatprep.subr.bf16.mxu1 %v3571_v17  ;;  %4645 = vst [vmem:[#allocation68_spill] sm:$0xff] %v3592_v55  ;;  %v64_v17 = vld [vmem:[#allocation5 + $0x50] sm:$0xff]  ;;  %v69_v2 = vld [vmem:[#allocation5 + $0x78] sm:$0xff]  ;;  %4647 = vst [vmem:[#allocation70_spill] sm:$0xff] %v3598_v33 }
  0x77   :  { %v68_v16 = vld [vmem:[#allocation5 + $0x70] sm:$0xff]  ;;  %v3607_v57 = vcombine.high %v65_v4, %v69_v2  ;;  %v3614_v48 = vcombine.low %v65_v4, %v69_v2 }
  0x78   :  { %v3604_v15 = vcombine.high %v64_v17, %v68_v16  ;;  %v3610_v47 = vcombine.low %v64_v17, %v68_v16 }
  0x79   :  { %1091 = vmatpush1.bf16.msra.mxu0 %v3574_v32  ;;  %1132 = vmatpush1.bf16.msra.mxu1 %v3578_v30  ;;  %4650 = vst [vmem:[#allocation73_spill] sm:$0xff] %v3607_v57  ;;  %v57_v30 = vld [vmem:[#allocation5 + $0x18] sm:$0xff]  ;;  %4652 = vst [vmem:[#allocation75_spill] sm:$0xff] %v3614_v48 }
  0x7a   :  { %1092 = vmatprep.subr.bf16.mxu0 %v3580_v58  ;;  %1133 = vmatprep.subr.bf16.mxu1 %v3583_v53  ;;  %4649 = vst [vmem:[#allocation72_spill] sm:$0xff] %v3604_v15  ;;  %v56_v53 = vld [vmem:[#allocation5 + $0x10] sm:$0xff]  ;;  %v61_v32 = vld [vmem:[#allocation5 + $0x38] sm:$0xff]  ;;  %4651 = vst [vmem:[#allocation74_spill] sm:$0xff] %v3610_v47 }
  0x7b   :  { %v60_v58 = vld [vmem:[#allocation5 + $0x30] sm:$0xff]  ;;  %v3619_v49 = vcombine.high %v57_v30, %v61_v32  ;;  %v3626_v2 = vcombine.low %v57_v30, %v61_v32 }
  0x7c   :  { %v3616_v46 = vcombine.high %v56_v53, %v60_v58  ;;  %v3622_v16 = vcombine.low %v56_v53, %v60_v58 }
  0x7d   :  { %1093 = vmatpush1.bf16.msra.mxu0 %v3586_v56  ;;  %1134 = vmatpush1.bf16.msra.mxu1 %v3590_v31  ;;  %4654 = vst [vmem:[#allocation77_spill] sm:$0xff] %v3619_v49  ;;  %v177_v31 = vld [vmem:[#allocation5 + $0x3d8] sm:$0xff]  ;;  %4656 = vst [vmem:[#allocation79_spill] sm:$0xff] %v3626_v2 }
  0x7e   :  { %1094 = vmatprep.subr.bf16.mxu0 %v3592_v55  ;;  %1135 = vmatprep.subr.bf16.mxu1 %v3595_v59  ;;  %4653 = vst [vmem:[#allocation76_spill] sm:$0xff] %v3616_v46  ;;  %v176_v59 = vld [vmem:[#allocation5 + $0x3d0] sm:$0xff]  ;;  %v181_v56 = vld [vmem:[#allocation5 + $0x3f8] sm:$0xff]  ;;  %4655 = vst [vmem:[#allocation78_spill] sm:$0xff] %v3622_v16 }
  0x7f   :  { %v180_v55 = vld [vmem:[#allocation5 + $0x3f0] sm:$0xff]  ;;  %v3631_v17 = vcombine.high %v177_v31, %v181_v56  ;;  %v3638_v32 = vcombine.low %v177_v31, %v181_v56 }
  0x80   :  { %v3628_v4 = vcombine.high %v176_v59, %v180_v55  ;;  %v3634_v58 = vcombine.low %v176_v59, %v180_v55 }
  0x81   :  { %1095 = vmatpush1.bf16.msra.mxu0 %v3598_v33  ;;  %1136 = vmatpush1.bf16.msra.mxu1 %v3602_v13  ;;  %4658 = vst [vmem:[#allocation81_spill] sm:$0xff] %v3631_v17  ;;  %v169_v13 = vld [vmem:[#allocation5 + $0x398] sm:$0xff]  ;;  %4660 = vst [vmem:[#allocation83_spill] sm:$0xff] %v3638_v32 }
  0x82   :  { %1096 = vmatprep.subr.bf16.mxu0 %v3604_v15  ;;  %1137 = vmatprep.subr.bf16.mxu1 %v3607_v57  ;;  %4657 = vst [vmem:[#allocation80_spill] sm:$0xff] %v3628_v4  ;;  %v168_v57 = vld [vmem:[#allocation5 + $0x390] sm:$0xff]  ;;  %v173_v33 = vld [vmem:[#allocation5 + $0x3b8] sm:$0xff]  ;;  %4659 = vst [vmem:[#allocation82_spill] sm:$0xff] %v3634_v58 }
  0x83   :  { %v172_v15 = vld [vmem:[#allocation5 + $0x3b0] sm:$0xff]  ;;  %v3643_v53 = vcombine.high %v169_v13, %v173_v33  ;;  %v3650_v56 = vcombine.low %v169_v13, %v173_v33 }
  0x84   :  { %v3640_v30 = vcombine.high %v168_v57, %v172_v15  ;;  %v3646_v55 = vcombine.low %v168_v57, %v172_v15 }
  0x85   :  { %1097 = vmatpush1.bf16.msra.mxu0 %v3610_v47  ;;  %1138 = vmatpush1.bf16.msra.mxu1 %v3614_v48  ;;  %4662 = vst [vmem:[#allocation85_spill] sm:$0xff] %v3643_v53  ;;  %v161_v48 = vld [vmem:[#allocation5 + $0x358] sm:$0xff]  ;;  %4664 = vst [vmem:[#allocation87_spill] sm:$0xff] %v3650_v56 }
  0x86   :  { %1098 = vmatprep.subr.bf16.mxu0 %v3616_v46  ;;  %1139 = vmatprep.subr.bf16.mxu1 %v3619_v49  ;;  %4661 = vst [vmem:[#allocation84_spill] sm:$0xff] %v3640_v30  ;;  %v160_v49 = vld [vmem:[#allocation5 + $0x350] sm:$0xff]  ;;  %v165_v47 = vld [vmem:[#allocation5 + $0x378] sm:$0xff]  ;;  %4663 = vst [vmem:[#allocation86_spill] sm:$0xff] %v3646_v55 }
  0x87   :  { %v164_v46 = vld [vmem:[#allocation5 + $0x370] sm:$0xff]  ;;  %v3655_v59 = vcombine.high %v161_v48, %v165_v47  ;;  %v3662_v33 = vcombine.low %v161_v48, %v165_v47 }
  0x88   :  { %v3652_v31 = vcombine.high %v160_v49, %v164_v46  ;;  %v3658_v15 = vcombine.low %v160_v49, %v164_v46 }
  0x89   :  { %1099 = vmatpush1.bf16.msra.mxu0 %v3622_v16  ;;  %1140 = vmatpush1.bf16.msra.mxu1 %v3626_v2  ;;  %4666 = vst [vmem:[#allocation89_spill] sm:$0xff] %v3655_v59  ;;  %v153_v2 = vld [vmem:[#allocation5 + $0x318] sm:$0xff]  ;;  %4668 = vst [vmem:[#allocation91_spill] sm:$0xff] %v3662_v33 }
  0x8a   :  { %1100 = vmatprep.subr.bf16.mxu0 %v3628_v4  ;;  %1141 = vmatprep.subr.bf16.mxu1 %v3631_v17  ;;  %4665 = vst [vmem:[#allocation88_spill] sm:$0xff] %v3652_v31  ;;  %v152_v17 = vld [vmem:[#allocation5 + $0x310] sm:$0xff]  ;;  %v157_v16 = vld [vmem:[#allocation5 + $0x338] sm:$0xff]  ;;  %4667 = vst [vmem:[#allocation90_spill] sm:$0xff] %v3658_v15 }
  0x8b   :  { %v156_v4 = vld [vmem:[#allocation5 + $0x330] sm:$0xff]  ;;  %v3667_v57 = vcombine.high %v153_v2, %v157_v16  ;;  %v3674_v47 = vcombine.low %v153_v2, %v157_v16 }
  0x8c   :  { %v3664_v13 = vcombine.high %v152_v17, %v156_v4  ;;  %v3670_v46 = vcombine.low %v152_v17, %v156_v4 }
  0x8d   :  { %1101 = vmatpush2.bf16.msra.mxu0 %v3634_v58  ;;  %1142 = vmatpush2.bf16.msra.mxu1 %v3638_v32  ;;  %4670 = vst [vmem:[#allocation93_spill] sm:$0xff] %v3667_v57  ;;  %v145_v32 = vld [vmem:[#allocation5 + $0x2d8] sm:$0xff]  ;;  %4672 = vst [vmem:[#allocation95_spill] sm:$0xff] %v3674_v47 }
  0x8e   :  { %1102 = vmatprep.subr.bf16.mxu0 %v3640_v30  ;;  %1143 = vmatprep.subr.bf16.mxu1 %v3643_v53  ;;  %4669 = vst [vmem:[#allocation92_spill] sm:$0xff] %v3664_v13  ;;  %v144_v53 = vld [vmem:[#allocation5 + $0x2d0] sm:$0xff]  ;;  %v149_v58 = vld [vmem:[#allocation5 + $0x2f8] sm:$0xff]  ;;  %4671 = vst [vmem:[#allocation94_spill] sm:$0xff] %v3670_v46 }
  0x8f   :  { %v148_v30 = vld [vmem:[#allocation5 + $0x2f0] sm:$0xff]  ;;  %v3679_v49 = vcombine.high %v145_v32, %v149_v58  ;;  %v3686_v16 = vcombine.low %v145_v32, %v149_v58 }
  0x90   :  { %v3676_v48 = vcombine.high %v144_v53, %v148_v30  ;;  %v3682_v4 = vcombine.low %v144_v53, %v148_v30 }
  0x91   :  { %1103 = vmatpush2.bf16.msra.mxu0 %v3646_v55  ;;  %1144 = vmatpush2.bf16.msra.mxu1 %v3650_v56  ;;  %4674 = vst [vmem:[#allocation97_spill] sm:$0xff] %v3679_v49  ;;  %v137_v56 = vld [vmem:[#allocation5 + $0x298] sm:$0xff]  ;;  %4675 = vst [vmem:[#allocation98_spill] sm:$0xff] %v3686_v16 }
  0x92   :  { %1104 = vmatprep.subr.bf16.mxu0 %v3652_v31  ;;  %1145 = vmatprep.subr.bf16.mxu1 %v3655_v59  ;;  %4673 = vst [vmem:[#allocation96_spill] sm:$0xff] %v3676_v48  ;;  %v136_v59 = vld [vmem:[#allocation5 + $0x290] sm:$0xff]  ;;  %v141_v55 = vld [vmem:[#allocation5 + $0x2b8] sm:$0xff] }
  0x93   :  { %v140_v31 = vld [vmem:[#allocation5 + $0x2b0] sm:$0xff]  ;;  %v3691_v17 = vcombine.high %v137_v56, %v141_v55  ;;  %v3698_v58 = vcombine.low %v137_v56, %v141_v55 }
  0x94   :  { %v3688_v2 = vcombine.high %v136_v59, %v140_v31  ;;  %v3694_v30 = vcombine.low %v136_v59, %v140_v31 }
  0x95   :  { %1105 = vmatpush2.bf16.msra.mxu0 %v3658_v15  ;;  %1146 = vmatpush2.bf16.msra.mxu1 %v3662_v33  ;;  %4677 = vst [vmem:[#allocation100_spill] sm:$0xff] %v3691_v17  ;;  %v129_v33 = vld [vmem:[#allocation5 + $0x258] sm:$0xff]  ;;  %4679 = vst [vmem:[#allocation102_spill] sm:$0xff] %v3698_v58 }
  0x96   :  { %1106 = vmatprep.subr.bf16.mxu0 %v3664_v13  ;;  %1147 = vmatprep.subr.bf16.mxu1 %v3667_v57  ;;  %4676 = vst [vmem:[#allocation99_spill] sm:$0xff] %v3688_v2  ;;  %v128_v57 = vld [vmem:[#allocation5 + $0x250] sm:$0xff]  ;;  %v133_v15 = vld [vmem:[#allocation5 + $0x278] sm:$0xff]  ;;  %4678 = vst [vmem:[#allocation101_spill] sm:$0xff] %v3694_v30 }
  0x97   :  { %v132_v13 = vld [vmem:[#allocation5 + $0x270] sm:$0xff]  ;;  %v3703_v53 = vcombine.high %v129_v33, %v133_v15  ;;  %v3710_v55 = vcombine.low %v129_v33, %v133_v15  ;;  %v3725_v15 = vld [vmem:[#allocation2 + $0x8] sm:$0xff] }
  0x98   :  { %v3700_v32 = vcombine.high %v128_v57, %v132_v13  ;;  %v3706_v31 = vcombine.low %v128_v57, %v132_v13  ;;  %v3733_v33 = vcombine.high %v3725_v15, %v3725_v15  ;;  %v4687_v57 = vld [vmem:[#allocation27_spill] sm:$0xff] }
  0x99   :  { %1107 = vmatpush2.bf16.msra.mxu0 %v3670_v46  ;;  %1148 = vmatpush2.bf16.msra.mxu1 %v3674_v47  ;;  %4681 = vst [vmem:[#allocation104_spill] sm:$0xff] %v3703_v53  ;;  %v121_v47 = vld [vmem:[#allocation5 + $0x218] sm:$0xff] }
  0x9a   :  { %1108 = vmatprep.subr.bf16.mxu0 %v3676_v48  ;;  %1149 = vmatprep.subr.bf16.mxu1 %v3679_v49  ;;  %4680 = vst [vmem:[#allocation103_spill] sm:$0xff] %v3700_v32  ;;  %v120_v49 = vld [vmem:[#allocation5 + $0x210] sm:$0xff]  ;;  %v125_v46 = vld [vmem:[#allocation5 + $0x238] sm:$0xff]  ;;  %4682 = vst [vmem:[#allocation105_spill] sm:$0xff] %v3706_v31 }
  0x9b   :  { %v124_v48 = vld [vmem:[#allocation5 + $0x230] sm:$0xff]  ;;  %v3715_v59 = vcombine.high %v121_v47, %v125_v46  ;;  %v3722_v13 = vcombine.low %v121_v47, %v125_v46  ;;  %v4688_v46 = vld [vmem:[#allocation28_spill] sm:$0xff]  ;;  %v4689_v47 = vld [vmem:[#allocation29_spill] sm:$0xff] }
  0x9c   :  { %v3712_v56 = vcombine.high %v120_v49, %v124_v48 }
  0x9d   :  { %1109 = vmatpush2.bf16.msra.mxu0 %v3682_v4  ;;  %1150 = vmatpush2.bf16.msra.mxu1 %v3686_v16  ;;  %4685 = vst [vmem:[#allocation108_spill] sm:$0xff] %v3722_v13 }
  0x9e   :  { %1110 = vmatprep.subr.bf16.mxu0 %v3688_v2  ;;  %1151 = vmatprep.subr.bf16.mxu1 %v3691_v17  ;;  %4683 = vst [vmem:[#allocation106_spill] sm:$0xff] %v3712_v56  ;;  %v3718_v17 = vcombine.low %v120_v49, %v124_v48  ;;  %v4690_v48 = vld [vmem:[#allocation30_spill] sm:$0xff]  ;;  %v4691_v49 = vld [vmem:[#allocation31_spill] sm:$0xff] }
  0xa0   :  { %4684 = vst [vmem:[#allocation107_spill] sm:$0xff] %v3718_v17 }
  0xa1   :  { %1111 = vmatpush2.bf16.msra.mxu0 %v3694_v30  ;;  %1152 = vmatpush2.bf16.msra.mxu1 %v3698_v58 }
  0xa2   :  { %1112 = vmatprep.subr.bf16.mxu0 %v3700_v32  ;;  %1153 = vmatprep.subr.bf16.mxu1 %v3703_v53 }
  0xa5   :  { %1113 = vmatpush2.bf16.msra.mxu0 %v3706_v31  ;;  %1154 = vmatpush2.bf16.msra.mxu1 %v3710_v55 }
  0xa6   :  { %1114 = vmatprep.subr.bf16.mxu0 %v3712_v56  ;;  %1155 = vmatprep.subr.bf16.mxu1 %v3715_v59 }
  0xa9   :  { %1115 = vmatpush2.bf16.msra.mxu0 %v3718_v17  ;;  %1156 = vmatpush2.bf16.msra.mxu1 %v3722_v13 }
  0xaa   :  { %1223 = vmatprep.subr.bf16.mxu0 %v3327_v3  ;;  %1264 = vmatprep.subr.bf16.mxu1 %v3331_v8 }
  0xac   :  { %1117 = vmatmul.mubr.bf16.vlgmr.msra.gmra.mxu0 %v3531_v1  ;;  %1158 = vmatmul.mubr.bf16.vlgmr.msra.gmra.mxu1 %v3531_v1  ;;  %v4686_v1 = vld [vmem:[#allocation26_spill] sm:$0xff] }
  0xad   :  { %1224 = vmatpush1.bf16.msra.mxu0 %v3329_v5  ;;  %1265 = vmatpush1.bf16.msra.mxu1 %v3333_v9 }
  0xae   :  { %1225 = vmatprep.subr.bf16.mxu0 %v3335_v10  ;;  %1266 = vmatprep.subr.bf16.mxu1 %v3338_v14 }
  0xaf   :  { %1255 = vmatprep.mubr.bf16.mxu0 %v3733_v33  ;;  %1296 = vmatprep.mubr.bf16.mxu1 %v3733_v33 }
  0xb1   :  { %1226 = vmatpush1.bf16.msra.mxu0 %v3342_v18  ;;  %1267 = vmatpush1.bf16.msra.mxu1 %v3346_v19 }
  0xb2   :  { %1227 = vmatprep.subr.bf16.mxu0 %v3348_v20  ;;  %1268 = vmatprep.subr.bf16.mxu1 %v3351_v21 }
  0xb5   :  { %1228 = vmatpush1.bf16.msra.mxu0 %v3354_v26  ;;  %1269 = vmatpush1.bf16.msra.mxu1 %v3358_v27 }
  0xb6   :  { %1229 = vmatprep.subr.bf16.mxu0 %v3360_v28  ;;  %1270 = vmatprep.subr.bf16.mxu1 %v3363_v29 }
  0xb9   :  { %1230 = vmatpush1.bf16.msra.mxu0 %v3366_v34  ;;  %1271 = vmatpush1.bf16.msra.mxu1 %v3370_v35 }
  0xba   :  { %1231 = vmatprep.subr.bf16.mxu0 %v3372_v36  ;;  %1272 = vmatprep.subr.bf16.mxu1 %v3375_v37 }
  0xbd   :  { %1232 = vmatpush1.bf16.msra.mxu0 %v3378_v42  ;;  %1273 = vmatpush1.bf16.msra.mxu1 %v3382_v43 }
  0xbe   :  { %1233 = vmatprep.subr.bf16.mxu0 %v3384_v44  ;;  %1274 = vmatprep.subr.bf16.mxu1 %v3387_v45 }
  0xc1   :  { %1234 = vmatpush1.bf16.msra.mxu0 %v3390_v50  ;;  %1275 = vmatpush1.bf16.msra.mxu1 %v3394_v51 }
  0xc2   :  { %1235 = vmatprep.subr.bf16.mxu0 %v3396_v52  ;;  %1276 = vmatprep.subr.bf16.mxu1 %v3401_v54 }
  0xc5   :  { %1236 = vmatpush1.bf16.msra.mxu0 %v3408_v60  ;;  %1277 = vmatpush1.bf16.msra.mxu1 %v3413_v61 }
  0xc6   :  { %1237 = vmatprep.subr.bf16.mxu0 %v3415_v62  ;;  %1278 = vmatprep.subr.bf16.mxu1 %v3418_v63 }
  0xc9   :  { %1238 = vmatpush1.bf16.msra.mxu0 %v3422_v6  ;;  %1279 = vmatpush1.bf16.msra.mxu1 %v3426_v7 }
  0xca   :  { %1239 = vmatprep.subr.bf16.mxu0 %v3428_v11  ;;  %1280 = vmatprep.subr.bf16.mxu1 %v3431_v12 }
  0xcd   :  { %1240 = vmatpush2.bf16.msra.mxu0 %v3434_v22  ;;  %1281 = vmatpush2.bf16.msra.mxu1 %v3438_v23 }
  0xce   :  { %1241 = vmatprep.subr.bf16.mxu0 %v3440_v24  ;;  %1282 = vmatprep.subr.bf16.mxu1 %v3443_v25  ;;  %v4692_v25 = vld [vmem:[#allocation32_spill] sm:$0xff] }
  0xd1   :  { %1242 = vmatpush2.bf16.msra.mxu0 %v3446_v38  ;;  %1283 = vmatpush2.bf16.msra.mxu1 %v3450_v39  ;;  %v4693_v38 = vld [vmem:[#allocation33_spill] sm:$0xff]  ;;  %v4694_v39 = vld [vmem:[#allocation34_spill] sm:$0xff] }
  0xd2   :  { %1243 = vmatprep.subr.bf16.mxu0 %v3452_v40  ;;  %1284 = vmatprep.subr.bf16.mxu1 %v3455_v41  ;;  %v4695_v40 = vld [vmem:[#allocation35_spill] sm:$0xff]  ;;  %v4696_v41 = vld [vmem:[#allocation36_spill] sm:$0xff] }
  0xd5   :  { %1244 = vmatpush2.bf16.msra.mxu0 %v4686_v1  ;;  %1285 = vmatpush2.bf16.msra.mxu1 %v4687_v57  ;;  %v4697_v1 = vld [vmem:[#allocation37_spill] sm:$0xff] }
  0xd6   :  { %1245 = vmatprep.subr.bf16.mxu0 %v4688_v46  ;;  %1286 = vmatprep.subr.bf16.mxu1 %v4689_v47  ;;  %v4698_v46 = vld [vmem:[#allocation39_spill] sm:$0xff]  ;;  %v4699_v47 = vld [vmem:[#allocation40_spill] sm:$0xff] }
  0xd9   :  { %1246 = vmatpush2.bf16.msra.mxu0 %v4690_v48  ;;  %1287 = vmatpush2.bf16.msra.mxu1 %v4691_v49  ;;  %v4700_v48 = vld [vmem:[#allocation41_spill] sm:$0xff]  ;;  %v4701_v49 = vld [vmem:[#allocation42_spill] sm:$0xff] }
  0xda   :  { %1247 = vmatprep.subr.bf16.mxu0 %v4692_v25  ;;  %1288 = vmatprep.subr.bf16.mxu1 %v4693_v38  ;;  %v4702_v25 = vld [vmem:[#allocation43_spill] sm:$0xff]  ;;  %v4703_v38 = vld [vmem:[#allocation44_spill] sm:$0xff] }
  0xdd   :  { %1248 = vmatpush2.bf16.msra.mxu0 %v4694_v39  ;;  %1289 = vmatpush2.bf16.msra.mxu1 %v4695_v40  ;;  %v4704_v39 = vld [vmem:[#allocation45_spill] sm:$0xff] }
  0xde   :  { %1249 = vmatprep.subr.bf16.mxu0 %v4696_v41  ;;  %1290 = vmatprep.subr.bf16.mxu1 %v4697_v1  ;;  %v3801_v41 = vcombine.low %v3725_v15, %v3725_v15  ;;  %v4705_v1 = vld [vmem:[#allocation46_spill] sm:$0xff]  ;;  %v4712_v15 = vld [vmem:[#allocation53_spill] sm:$0xff] }
  0xe1   :  { %1250 = vmatpush2.bf16.msra.mxu0 %v3494_v0  ;;  %1291 = vmatpush2.bf16.msra.mxu1 %v4698_v46  ;;  %v4706_v0 = vld [vmem:[#allocation47_spill] sm:$0xff]  ;;  %v4707_v46 = vld [vmem:[#allocation48_spill] sm:$0xff] }
  0xe2   :  { %1251 = vmatprep.subr.bf16.mxu0 %v4699_v47  ;;  %1292 = vmatprep.subr.bf16.mxu1 %v4700_v48  ;;  %v4708_v47 = vld [vmem:[#allocation49_spill] sm:$0xff]  ;;  %v4722_v48 = vld [vmem:[#allocation63_spill] sm:$0xff] }
  0xe5   :  { %1252 = vmatpush2.bf16.msra.mxu0 %v4701_v49  ;;  %1293 = vmatpush2.bf16.msra.mxu1 %v4702_v25  ;;  %v4709_v25 = vld [vmem:[#allocation50_spill] sm:$0xff] }
  0xe6   :  { %1253 = vmatprep.subr.bf16.mxu0 %v4703_v38  ;;  %1294 = vmatprep.subr.bf16.mxu1 %v4704_v39  ;;  %v4710_v38 = vld [vmem:[#allocation51_spill] sm:$0xff]  ;;  %v4711_v39 = vld [vmem:[#allocation52_spill] sm:$0xff]  ;;  %v4717_v49 = vld [vmem:[#allocation58_spill] sm:$0xff] }
  0xe9   :  { %1254 = vmatpush2.bf16.msra.mxu0 %v4705_v1  ;;  %1295 = vmatpush2.bf16.msra.mxu1 %v4706_v0  ;;  %v4713_v0 = vld [vmem:[#allocation54_spill] sm:$0xff]  ;;  %v4716_v1 = vld [vmem:[#allocation57_spill] sm:$0xff] }
  0xea   :  { %1305 = vmatprep.subr.bf16.mxu0 %v4707_v46  ;;  %1346 = vmatprep.subr.bf16.mxu1 %v4708_v47  ;;  %v4714_v46 = vld [vmem:[#allocation55_spill] sm:$0xff]  ;;  %v4715_v47 = vld [vmem:[#allocation56_spill] sm:$0xff] }
  0xec   :  { %1256 = vmatmul.mubr.bf16.vlgmr.msra.gmra.mxu0 %v3801_v41  ;;  %1297 = vmatmul.mubr.bf16.vlgmr.msra.gmra.mxu1 %v3801_v41 }
  0xed   :  { %1306 = vmatpush1.bf16.msra.mxu0 %v4709_v25  ;;  %1347 = vmatpush1.bf16.msra.mxu1 %v4710_v38  ;;  %v4718_v25 = vld [vmem:[#allocation59_spill] sm:$0xff]  ;;  %v4719_v38 = vld [vmem:[#allocation60_spill] sm:$0xff] }
  0xee   :  { %1307 = vmatprep.subr.bf16.mxu0 %v4711_v39  ;;  %1348 = vmatprep.subr.bf16.mxu1 %v4712_v15  ;;  %v4720_v39 = vld [vmem:[#allocation61_spill] sm:$0xff]  ;;  %v4721_v15 = vld [vmem:[#allocation62_spill] sm:$0xff] }
  0xef   :  { %1337 = vmatprep.mubr.bf16.mxu0 %v3733_v33  ;;  %1378 = vmatprep.mubr.bf16.mxu1 %v3733_v33  ;;  %v4723_v33 = vld [vmem:[#allocation64_spill] sm:$0xff] }
  0xf1   :  { %1308 = vmatpush1.bf16.msra.mxu0 %v4713_v0  ;;  %1349 = vmatpush1.bf16.msra.mxu1 %v4714_v46  ;;  %v4724_v0 = vld [vmem:[#allocation65_spill] sm:$0xff]  ;;  %v4725_v46 = vld [vmem:[#allocation66_spill] sm:$0xff] }
  0xf2   :  { %1309 = vmatprep.subr.bf16.mxu0 %v4715_v47  ;;  %1350 = vmatprep.subr.bf16.mxu1 %v4716_v1  ;;  %v4726_v47 = vld [vmem:[#allocation67_spill] sm:$0xff]  ;;  %v4727_v1 = vld [vmem:[#allocation68_spill] sm:$0xff] }
  0xf5   :  { %1310 = vmatpush1.bf16.msra.mxu0 %v4717_v49  ;;  %1351 = vmatpush1.bf16.msra.mxu1 %v4718_v25  ;;  %v4728_v49 = vld [vmem:[#allocation69_spill] sm:$0xff]  ;;  %v4729_v25 = vld [vmem:[#allocation70_spill] sm:$0xff] }
  0xf6   :  { %1311 = vmatprep.subr.bf16.mxu0 %v4719_v38  ;;  %1352 = vmatprep.subr.bf16.mxu1 %v4720_v39  ;;  %v4730_v38 = vld [vmem:[#allocation71_spill] sm:$0xff]  ;;  %v4731_v39 = vld [vmem:[#allocation72_spill] sm:$0xff] }
  0xf9   :  { %1312 = vmatpush1.bf16.msra.mxu0 %v4721_v15  ;;  %1353 = vmatpush1.bf16.msra.mxu1 %v4722_v48  ;;  %v4732_v15 = vld [vmem:[#allocation73_spill] sm:$0xff]  ;;  %v4733_v48 = vld [vmem:[#allocation74_spill] sm:$0xff] }
  0xfa   :  { %1313 = vmatprep.subr.bf16.mxu0 %v4723_v33  ;;  %1354 = vmatprep.subr.bf16.mxu1 %v4724_v0  ;;  %v4734_v33 = vld [vmem:[#allocation75_spill] sm:$0xff]  ;;  %v4735_v0 = vld [vmem:[#allocation76_spill] sm:$0xff] }
  0xfd   :  { %1314 = vmatpush1.bf16.msra.mxu0 %v4725_v46  ;;  %1355 = vmatpush1.bf16.msra.mxu1 %v4726_v47  ;;  %v4736_v46 = vld [vmem:[#allocation77_spill] sm:$0xff]  ;;  %v4737_v47 = vld [vmem:[#allocation78_spill] sm:$0xff] }
  0xfe   :  { %1315 = vmatprep.subr.bf16.mxu0 %v4727_v1  ;;  %1356 = vmatprep.subr.bf16.mxu1 %v4728_v49  ;;  %v4738_v1 = vld [vmem:[#allocation79_spill] sm:$0xff]  ;;  %v4739_v49 = vld [vmem:[#allocation80_spill] sm:$0xff] }
 0x101   :  { %1316 = vmatpush1.bf16.msra.mxu0 %v4729_v25  ;;  %1357 = vmatpush1.bf16.msra.mxu1 %v4730_v38  ;;  %v4740_v25 = vld [vmem:[#allocation81_spill] sm:$0xff]  ;;  %v4741_v38 = vld [vmem:[#allocation82_spill] sm:$0xff] }
 0x102   :  { %1317 = vmatprep.subr.bf16.mxu0 %v4731_v39  ;;  %1358 = vmatprep.subr.bf16.mxu1 %v4732_v15  ;;  %v4742_v39 = vld [vmem:[#allocation83_spill] sm:$0xff]  ;;  %v4743_v15 = vld [vmem:[#allocation84_spill] sm:$0xff] }
 0x105   :  { %1318 = vmatpush1.bf16.msra.mxu0 %v4733_v48  ;;  %1359 = vmatpush1.bf16.msra.mxu1 %v4734_v33  ;;  %v4744_v48 = vld [vmem:[#allocation85_spill] sm:$0xff]  ;;  %v4745_v33 = vld [vmem:[#allocation86_spill] sm:$0xff] }
 0x106   :  { %1319 = vmatprep.subr.bf16.mxu0 %v4735_v0  ;;  %1360 = vmatprep.subr.bf16.mxu1 %v4736_v46  ;;  %v4746_v0 = vld [vmem:[#allocation87_spill] sm:$0xff]  ;;  %v4747_v46 = vld [vmem:[#allocation88_spill] sm:$0xff] }
 0x109   :  { %1320 = vmatpush1.bf16.msra.mxu0 %v4737_v47  ;;  %1361 = vmatpush1.bf16.msra.mxu1 %v4738_v1  ;;  %v4748_v47 = vld [vmem:[#allocation89_spill] sm:$0xff]  ;;  %v4749_v1 = vld [vmem:[#allocation90_spill] sm:$0xff] }
 0x10a   :  { %1321 = vmatprep.subr.bf16.mxu0 %v4739_v49  ;;  %1362 = vmatprep.subr.bf16.mxu1 %v4740_v25  ;;  %v4750_v49 = vld [vmem:[#allocation91_spill] sm:$0xff]  ;;  %v4751_v25 = vld [vmem:[#allocation92_spill] sm:$0xff] }
 0x10d   :  { %1322 = vmatpush2.bf16.msra.mxu0 %v4741_v38  ;;  %1363 = vmatpush2.bf16.msra.mxu1 %v4742_v39  ;;  %v4752_v38 = vld [vmem:[#allocation93_spill] sm:$0xff]  ;;  %v4753_v39 = vld [vmem:[#allocation94_spill] sm:$0xff] }
 0x10e   :  { %1323 = vmatprep.subr.bf16.mxu0 %v4743_v15  ;;  %1364 = vmatprep.subr.bf16.mxu1 %v4744_v48  ;;  %v4754_v15 = vld [vmem:[#allocation95_spill] sm:$0xff]  ;;  %v4755_v48 = vld [vmem:[#allocation96_spill] sm:$0xff] }
 0x111   :  { %1324 = vmatpush2.bf16.msra.mxu0 %v4745_v33  ;;  %1365 = vmatpush2.bf16.msra.mxu1 %v4746_v0  ;;  %v4756_v33 = vld [vmem:[#allocation97_spill] sm:$0xff] }
 0x112   :  { %1325 = vmatprep.subr.bf16.mxu0 %v4747_v46  ;;  %1366 = vmatprep.subr.bf16.mxu1 %v4748_v47 }
 0x115   :  { %1326 = vmatpush2.bf16.msra.mxu0 %v4749_v1  ;;  %1367 = vmatpush2.bf16.msra.mxu1 %v4750_v49  ;;  %v4757_v1 = vld [vmem:[#allocation100_spill] sm:$0xff] }
 0x116   :  { %1327 = vmatprep.subr.bf16.mxu0 %v4751_v25  ;;  %1368 = vmatprep.subr.bf16.mxu1 %v4752_v38 }
 0x119   :  { %1328 = vmatpush2.bf16.msra.mxu0 %v4753_v39  ;;  %1369 = vmatpush2.bf16.msra.mxu1 %v4754_v15 }
 0x11a   :  { %1329 = vmatprep.subr.bf16.mxu0 %v4755_v48  ;;  %1370 = vmatprep.subr.bf16.mxu1 %v4756_v33 }
 0x11d   :  { %1330 = vmatpush2.bf16.msra.mxu0 %v3682_v4  ;;  %1371 = vmatpush2.bf16.msra.mxu1 %v3686_v16  ;;  %v3871_v16 = vld [vmem:[#allocation2 + $0x10] sm:$0xff] }
 0x11e   :  { %1331 = vmatprep.subr.bf16.mxu0 %v3688_v2  ;;  %1372 = vmatprep.subr.bf16.mxu1 %v4757_v1 }
 0x121   :  { %1332 = vmatpush2.bf16.msra.mxu0 %v3694_v30  ;;  %1373 = vmatpush2.bf16.msra.mxu1 %v3698_v58 }
 0x122   :  { %1333 = vmatprep.subr.bf16.mxu0 %v3700_v32  ;;  %1374 = vmatprep.subr.bf16.mxu1 %v3703_v53  ;;  %v3879_v53 = vcombine.high %v3871_v16, %v3871_v16 }
 0x125   :  { %1334 = vmatpush2.bf16.msra.mxu0 %v3706_v31  ;;  %1375 = vmatpush2.bf16.msra.mxu1 %v3710_v55 }
 0x126   :  { %1335 = vmatprep.subr.bf16.mxu0 %v3712_v56  ;;  %1376 = vmatprep.subr.bf16.mxu1 %v3715_v59 }
 0x129   :  { %1336 = vmatpush2.bf16.msra.mxu0 %v3718_v17  ;;  %1377 = vmatpush2.bf16.msra.mxu1 %v3722_v13 }
 0x12a   :  { %1452 = vmatprep.subr.bf16.mxu0 %v3327_v3  ;;  %1493 = vmatprep.subr.bf16.mxu1 %v3331_v8 }
 0x12c   :  { %v3881_v31 = vpop.f32.mrf.mxu0  ;;  %1338 = vmatmul.mubr.bf16.vlgmr.msra.gmra.mxu0 %v3801_v41  ;;  %v3884_v56 = vpop.f32.mrf.mxu1  ;;  %1379 = vmatmul.mubr.bf16.vlgmr.msra.gmra.mxu1 %v3801_v41 }
 0x12d   :  { %1453 = vmatpush1.bf16.msra.mxu0 %v3329_v5  ;;  %1494 = vmatpush1.bf16.msra.mxu1 %v3333_v9 }
 0x12e   :  { %v3889_v13 = vpop.f32.mrf.mxu0  ;;  %1454 = vmatprep.subr.bf16.mxu0 %v3335_v10  ;;  %v3892_v8 = vpop.f32.mrf.mxu1  ;;  %1495 = vmatprep.subr.bf16.mxu1 %v3338_v14 }
 0x12f   :  { %1484 = vmatprep.mubr.bf16.mxu0 %v3879_v53  ;;  %1525 = vmatprep.mubr.bf16.mxu1 %v3879_v53 }
 0x130   :  { %v1040_v3 = vpop.f32.mrf.mxu0  ;;  %v1081_v17 = vpop.f32.mrf.mxu1 }
 0x131   :  { %1455 = vmatpush1.bf16.msra.mxu0 %v3342_v18  ;;  %1496 = vmatpush1.bf16.msra.mxu1 %v3346_v19  ;;  %v4758_v3 = vld [vmem:[#allocation21_spill] sm:$0xff]  ;;  %v4760_v17 = vld [vmem:[#allocation23_spill] sm:$0xff] }
 0x132   :  { %v1041_v41 = vpop.f32.mrf.mxu0  ;;  %1456 = vmatprep.subr.bf16.mxu0 %v3348_v20  ;;  %v1082_v9 = vpop.f32.mrf.mxu1  ;;  %1497 = vmatprep.subr.bf16.mxu1 %v3351_v21 }
 0x133   :  { %v4759_v9 = vld [vmem:[#allocation22_spill] sm:$0xff]  ;;  %v4761_v41 = vld [vmem:[#allocation24_spill] sm:$0xff] }
 0x135   :  { %1457 = vmatpush1.bf16.msra.mxu0 %v3354_v26  ;;  %1498 = vmatpush1.bf16.msra.mxu1 %v3358_v27 }
 0x136   :  { %1458 = vmatprep.subr.bf16.mxu0 %v3360_v28  ;;  %1499 = vmatprep.subr.bf16.mxu1 %v3363_v29 }
 0x139   :  { %1459 = vmatpush1.bf16.msra.mxu0 %v3366_v34  ;;  %1500 = vmatpush1.bf16.msra.mxu1 %v3370_v35 }
 0x13a   :  { %1460 = vmatprep.subr.bf16.mxu0 %v3372_v36  ;;  %1501 = vmatprep.subr.bf16.mxu1 %v3375_v37 }
 0x13d   :  { %1461 = vmatpush1.bf16.msra.mxu0 %v3378_v42  ;;  %1502 = vmatpush1.bf16.msra.mxu1 %v3382_v43 }
 0x13e   :  { %1462 = vmatprep.subr.bf16.mxu0 %v3384_v44  ;;  %1503 = vmatprep.subr.bf16.mxu1 %v3387_v45 }
 0x141   :  { %1463 = vmatpush1.bf16.msra.mxu0 %v3390_v50  ;;  %1504 = vmatpush1.bf16.msra.mxu1 %v3394_v51 }
 0x142   :  { %1464 = vmatprep.subr.bf16.mxu0 %v3396_v52  ;;  %1505 = vmatprep.subr.bf16.mxu1 %v3401_v54 }
 0x145   :  { %1465 = vmatpush1.bf16.msra.mxu0 %v3408_v60  ;;  %1506 = vmatpush1.bf16.msra.mxu1 %v3413_v61 }
 0x146   :  { %1466 = vmatprep.subr.bf16.mxu0 %v3415_v62  ;;  %1507 = vmatprep.subr.bf16.mxu1 %v3418_v63 }
 0x149   :  { %1467 = vmatpush1.bf16.msra.mxu0 %v3422_v6  ;;  %1508 = vmatpush1.bf16.msra.mxu1 %v3426_v7  ;;  %v4762_v6 = vld [vmem:[#allocation25_spill] sm:$0xff]  ;;  %v4763_v7 = vld [vmem:[#allocation26_spill] sm:$0xff] }
 0x14a   :  { %1468 = vmatprep.subr.bf16.mxu0 %v3428_v11  ;;  %1509 = vmatprep.subr.bf16.mxu1 %v3431_v12  ;;  %v4764_v12 = vld [vmem:[#allocation28_spill] sm:$0xff] }
 0x14d   :  { %1469 = vmatpush2.bf16.msra.mxu0 %v3434_v22  ;;  %1510 = vmatpush2.bf16.msra.mxu1 %v3438_v23  ;;  %v4765_v22 = vld [vmem:[#allocation29_spill] sm:$0xff]  ;;  %v4766_v23 = vld [vmem:[#allocation30_spill] sm:$0xff] }
 0x14e   :  { %1470 = vmatprep.subr.bf16.mxu0 %v3440_v24  ;;  %1511 = vmatprep.subr.bf16.mxu1 %v4758_v3  ;;  %v4767_v24 = vld [vmem:[#allocation31_spill] sm:$0xff]  ;;  %v4768_v3 = vld [vmem:[#allocation32_spill] sm:$0xff] }
 0x151   :  { %1471 = vmatpush2.bf16.msra.mxu0 %v4759_v9  ;;  %1512 = vmatpush2.bf16.msra.mxu1 %v4760_v17  ;;  %v4769_v9 = vld [vmem:[#allocation33_spill] sm:$0xff]  ;;  %v4770_v17 = vld [vmem:[#allocation34_spill] sm:$0xff] }
 0x152   :  { %1472 = vmatprep.subr.bf16.mxu0 %v4761_v41  ;;  %1513 = vmatprep.subr.bf16.mxu1 %v4762_v6  ;;  %v4771_v6 = vld [vmem:[#allocation36_spill] sm:$0xff] }
 0x155   :  { %1473 = vmatpush2.bf16.msra.mxu0 %v4763_v7  ;;  %1514 = vmatpush2.bf16.msra.mxu1 %v4687_v57  ;;  %v4772_v7 = vld [vmem:[#allocation37_spill] sm:$0xff]  ;;  %v4773_v57 = vld [vmem:[#allocation38_spill] sm:$0xff] }
 0x156   :  { %1474 = vmatprep.subr.bf16.mxu0 %v4764_v12  ;;  %1515 = vmatprep.subr.bf16.mxu1 %v4765_v22  ;;  %v4774_v12 = vld [vmem:[#allocation39_spill] sm:$0xff]  ;;  %v4775_v22 = vld [vmem:[#allocation40_spill] sm:$0xff] }
 0x159   :  { %1475 = vmatpush2.bf16.msra.mxu0 %v4766_v23  ;;  %1516 = vmatpush2.bf16.msra.mxu1 %v4767_v24  ;;  %v4776_v23 = vld [vmem:[#allocation41_spill] sm:$0xff]  ;;  %v4777_v24 = vld [vmem:[#allocation42_spill] sm:$0xff] }
 0x15a   :  { %1476 = vmatprep.subr.bf16.mxu0 %v4768_v3  ;;  %1517 = vmatprep.subr.bf16.mxu1 %v4769_v9  ;;  %v4778_v3 = vld [vmem:[#allocation43_spill] sm:$0xff]  ;;  %v4779_v9 = vld [vmem:[#allocation44_spill] sm:$0xff] }
 0x15d   :  { %1477 = vmatpush2.bf16.msra.mxu0 %v4770_v17  ;;  %1518 = vmatpush2.bf16.msra.mxu1 %v4695_v40  ;;  %v4780_v17 = vld [vmem:[#allocation45_spill] sm:$0xff] }
 0x15e   :  { %1478 = vmatprep.subr.bf16.mxu0 %v4771_v6  ;;  %1519 = vmatprep.subr.bf16.mxu1 %v4772_v7  ;;  %v3955_v6 = vcombine.low %v3871_v16, %v3871_v16  ;;  %v4781_v7 = vld [vmem:[#allocation46_spill] sm:$0xff]  ;;  %v4788_v16 = vld [vmem:[#allocation51_spill] sm:$0xff]  ;;  %v4796_v40 = vld [vmem:[#allocation57_spill] sm:$0xff] }
 0x161   :  { %1479 = vmatpush2.bf16.msra.mxu0 %v4773_v57  ;;  %1520 = vmatpush2.bf16.msra.mxu1 %v4774_v12  ;;  %v4782_v57 = vld [vmem:[#allocation47_spill] sm:$0xff]  ;;  %v4783_v12 = vld [vmem:[#allocation48_spill] sm:$0xff] }
 0x162   :  { %1480 = vmatprep.subr.bf16.mxu0 %v4775_v22  ;;  %1521 = vmatprep.subr.bf16.mxu1 %v4776_v23  ;;  %v4784_v22 = vld [vmem:[#allocation49_spill] sm:$0xff] }
 0x165   :  { %1481 = vmatpush2.bf16.msra.mxu0 %v4777_v24  ;;  %1522 = vmatpush2.bf16.msra.mxu1 %v4778_v3 }
 0x166   :  { %1482 = vmatprep.subr.bf16.mxu0 %v4779_v9  ;;  %1523 = vmatprep.subr.bf16.mxu1 %v4780_v17  ;;  %v4787_v17 = vld [vmem:[#allocation50_spill] sm:$0xff] }
 0x169   :  { %1483 = vmatpush2.bf16.msra.mxu0 %v4781_v7  ;;  %1524 = vmatpush2.bf16.msra.mxu1 %v4782_v57  ;;  %v4790_v7 = vld [vmem:[#allocation52_spill] sm:$0xff] }
 0x16a   :  { %1534 = vmatprep.subr.bf16.mxu0 %v4783_v12  ;;  %1575 = vmatprep.subr.bf16.mxu1 %v4784_v22  ;;  %v4792_v12 = vld [vmem:[#allocation53_spill] sm:$0xff] }
 0x16c   :  { %v3961_v23 = vpop.f32.mrf.mxu0  ;;  %1485 = vmatmul.mubr.bf16.vlgmr.msra.gmra.mxu0 %v3955_v6  ;;  %v3964_v3 = vpop.f32.mrf.mxu1  ;;  %1526 = vmatmul.mubr.bf16.vlgmr.msra.gmra.mxu1 %v3955_v6 }
 0x16d   :  { %4785 = vst [vmem:[#allocation87_spill] sm:$0xff] %v3961_v23  ;;  %4786 = vst [vmem:[#allocation89_spill] sm:$0xff] %v3964_v3  ;;  %1535 = vmatpush1.bf16.msra.mxu0 %v4787_v17  ;;  %1576 = vmatpush1.bf16.msra.mxu1 %v4788_v16  ;;  %v4793_v3 = vld [vmem:[#allocation54_spill] sm:$0xff]  ;;  %v4794_v23 = vld [vmem:[#allocation55_spill] sm:$0xff] }
 0x16e   :  { %v3969_v9 = vpop.f32.mrf.mxu0  ;;  %1536 = vmatprep.subr.bf16.mxu0 %v4790_v7  ;;  %v3972_v57 = vpop.f32.mrf.mxu1  ;;  %1577 = vmatprep.subr.bf16.mxu1 %v4792_v12  ;;  %v4795_v16 = vld [vmem:[#allocation56_spill] sm:$0xff]  ;;  %v4797_v7 = vld [vmem:[#allocation58_spill] sm:$0xff] }
 0x16f   :  { %4789 = vst [vmem:[#allocation95_spill] sm:$0xff] %v3969_v9  ;;  %4791 = vst [vmem:[#allocation24_spill] sm:$0xff] %v3972_v57  ;;  %1566 = vmatprep.mubr.bf16.mxu0 %v3879_v53  ;;  %1607 = vmatprep.mubr.bf16.mxu1 %v3879_v53  ;;  %v4798_v57 = vld [vmem:[#allocation59_spill] sm:$0xff]  ;;  %v4799_v12 = vld [vmem:[#allocation60_spill] sm:$0xff] }
 0x170   :  { %v1122_v22 = vpop.f32.mrf.mxu0  ;;  %v1163_v24 = vpop.f32.mrf.mxu1  ;;  %v4801_v53 = vld [vmem:[#allocation62_spill] sm:$0xff] }
 0x171   :  { %1537 = vmatpush1.bf16.msra.mxu0 %v4793_v3  ;;  %1578 = vmatpush1.bf16.msra.mxu1 %v4794_v23  ;;  %v4800_v22 = vld [vmem:[#allocation61_spill] sm:$0xff]  ;;  %v4802_v24 = vld [vmem:[#allocation63_spill] sm:$0xff]  ;;  %v4803_v3 = vld [vmem:[#allocation64_spill] sm:$0xff] }
 0x172   :  { %v1123_v17 = vpop.f32.mrf.mxu0  ;;  %1538 = vmatprep.subr.bf16.mxu0 %v4795_v16  ;;  %v1164_v9 = vpop.f32.mrf.mxu1  ;;  %1579 = vmatprep.subr.bf16.mxu1 %v4796_v40  ;;  %v4805_v16 = vld [vmem:[#allocation66_spill] sm:$0xff]  ;;  %v4807_v40 = vld [vmem:[#allocation68_spill] sm:$0xff] }
 0x173   :  { %v4804_v17 = vld [vmem:[#allocation65_spill] sm:$0xff]  ;;  %v4806_v9 = vld [vmem:[#allocation67_spill] sm:$0xff] }
 0x175   :  { %1539 = vmatpush1.bf16.msra.mxu0 %v4797_v7  ;;  %1580 = vmatpush1.bf16.msra.mxu1 %v4798_v57  ;;  %v4808_v7 = vld [vmem:[#allocation69_spill] sm:$0xff]  ;;  %v4809_v57 = vld [vmem:[#allocation70_spill] sm:$0xff] }
 0x176   :  { %1540 = vmatprep.subr.bf16.mxu0 %v4799_v12  ;;  %1581 = vmatprep.subr.bf16.mxu1 %v4800_v22  ;;  %v4810_v12 = vld [vmem:[#allocation71_spill] sm:$0xff]  ;;  %v4811_v22 = vld [vmem:[#allocation72_spill] sm:$0xff] }
 0x179   :  { %1541 = vmatpush1.bf16.msra.mxu0 %v4801_v53  ;;  %1582 = vmatpush1.bf16.msra.mxu1 %v4802_v24  ;;  %v4812_v53 = vld [vmem:[#allocation73_spill] sm:$0xff]  ;;  %v4813_v24 = vld [vmem:[#allocation74_spill] sm:$0xff] }
 0x17a   :  { %1542 = vmatprep.subr.bf16.mxu0 %v4803_v3  ;;  %1583 = vmatprep.subr.bf16.mxu1 %v4804_v17  ;;  %v4814_v3 = vld [vmem:[#allocation75_spill] sm:$0xff]  ;;  %v4815_v17 = vld [vmem:[#allocation76_spill] sm:$0xff] }
 0x17d   :  { %1543 = vmatpush1.bf16.msra.mxu0 %v4805_v16  ;;  %1584 = vmatpush1.bf16.msra.mxu1 %v4806_v9  ;;  %v4816_v16 = vld [vmem:[#allocation77_spill] sm:$0xff]  ;;  %v4817_v9 = vld [vmem:[#allocation78_spill] sm:$0xff] }
 0x17e   :  { %1544 = vmatprep.subr.bf16.mxu0 %v4807_v40  ;;  %1585 = vmatprep.subr.bf16.mxu1 %v4808_v7  ;;  %v4818_v40 = vld [vmem:[#allocation79_spill] sm:$0xff]  ;;  %v4819_v7 = vld [vmem:[#allocation80_spill] sm:$0xff] }
 0x181   :  { %1545 = vmatpush1.bf16.msra.mxu0 %v4809_v57  ;;  %1586 = vmatpush1.bf16.msra.mxu1 %v4810_v12  ;;  %v4820_v57 = vld [vmem:[#allocation81_spill] sm:$0xff]  ;;  %v4821_v12 = vld [vmem:[#allocation82_spill] sm:$0xff] }
 0x182   :  { %1546 = vmatprep.subr.bf16.mxu0 %v4811_v22  ;;  %1587 = vmatprep.subr.bf16.mxu1 %v4812_v53  ;;  %v4822_v22 = vld [vmem:[#allocation83_spill] sm:$0xff]  ;;  %v4823_v53 = vld [vmem:[#allocation84_spill] sm:$0xff] }
 0x185   :  { %1547 = vmatpush1.bf16.msra.mxu0 %v4813_v24  ;;  %1588 = vmatpush1.bf16.msra.mxu1 %v4814_v3  ;;  %v4824_v24 = vld [vmem:[#allocation85_spill] sm:$0xff]  ;;  %v315_v3 = vlaneseq }
 0x186   :  { %1548 = vmatprep.subr.bf16.mxu0 %v4815_v17  ;;  %1589 = vmatprep.subr.bf16.mxu1 %v4816_v16  ;;  %v4825_v17 = vld [vmem:[#allocation86_spill] sm:$0xff] }
 0x189   :  { %1549 = vmatpush1.bf16.msra.mxu0 %v4817_v9  ;;  %1590 = vmatpush1.bf16.msra.mxu1 %v4818_v40 }
 0x18a   :  { %1550 = vmatprep.subr.bf16.mxu0 %v4819_v7  ;;  %1591 = vmatprep.subr.bf16.mxu1 %v4820_v57  ;;  %v4013_v7 = vshrl.u32 %v315_v3, 7  ;;  %v4826_v57 = vld [vmem:[#allocation90_spill] sm:$0xff] }
 0x18c   :  { %v4581_v3 = vsub.s32 1, %v4013_v7 }
 0x18d   :  { %1551 = vmatpush2.bf16.msra.mxu0 %v4821_v12  ;;  %1592 = vmatpush2.bf16.msra.mxu1 %v4822_v22 }
 0x18e   :  { %1552 = vmatprep.subr.bf16.mxu0 %v4823_v53  ;;  %1593 = vmatprep.subr.bf16.mxu1 %v4824_v24  ;;  %v4580_v24 = vsub.s32 0, %v4013_v7 }
 0x191   :  { %1553 = vmatpush2.bf16.msra.mxu0 %v4825_v17  ;;  %1594 = vmatpush2.bf16.msra.mxu1 %v4746_v0  ;;  %v4021_v17 = vld [vmem:[#allocation7] ss:$2 sm:$0xff] }
 0x192   :  { %1554 = vmatprep.subr.bf16.mxu0 %v4747_v46  ;;  %1595 = vmatprep.subr.bf16.mxu1 %v4748_v47  ;;  %v325_v46 = vsub.s32 2, %v4013_v7 }
 0x195   :  { %1555 = vmatpush2.bf16.msra.mxu0 %v4826_v57  ;;  %1596 = vmatpush2.bf16.msra.mxu1 %v4750_v49  ;;  %v4828_v49 = vld [vmem:[#allocation98_spill] sm:$0xff] }
 0x196   :  { %1556 = vmatprep.subr.bf16.mxu0 %v4751_v25  ;;  %1597 = vmatprep.subr.bf16.mxu1 %v4752_v38  ;;  %v329_v25 = vsub.s32 3, %v4013_v7  ;;  %v4032_v38 = vrot.slane %v4021_v17, %v4580_v24 }
 0x198   :  { %4827 = vst [vmem:[#allocation55_spill] sm:$0xff] %v4032_v38  ;;  %v1037_v24 = vadd.f32 %v3881_v31, %v4032_v38 }
 0x199   :  { %1557 = vmatpush2.bf16.msra.mxu0 %v4753_v39  ;;  %1598 = vmatpush2.bf16.msra.mxu1 %v4754_v15  ;;  %v4036_v39 = vrot.slane %v4021_v17, %v325_v46 }
 0x19a   :  { %1558 = vmatprep.subr.bf16.mxu0 %v4755_v48  ;;  %1599 = vmatprep.subr.bf16.mxu1 %v4756_v33  ;;  %v4043_v33 = vrot.slane %v4021_v17, %v4581_v3  ;;  %v4047_v48 = vrot.slane %v4021_v17, %v329_v25 }
 0x19b   :  { %v1078_v46 = vadd.f32 %v3884_v56, %v4036_v39 }
 0x19c   :  { %v1039_v3 = vadd.f32 %v3889_v13, %v4043_v33  ;;  %v1080_v25 = vadd.f32 %v3892_v8, %v4047_v48  ;;  %v4832_v13 = vld [vmem:[#allocation107_spill] sm:$0xff]  ;;  %v4834_v8 = vld [vmem:[#allocation12_spill] sm:$0xff] }
 0x19d   :  { %1559 = vmatpush2.bf16.msra.mxu0 %v3682_v4  ;;  %1600 = vmatpush2.bf16.msra.mxu1 %v4828_v49  ;;  %v4830_v49 = vld [vmem:[#allocation105_spill] sm:$0xff]  ;;  %v2886_v31 = vmul.f32 -1.442695, %v1078_v46 }
 0x19e   :  { %1560 = vmatprep.subr.bf16.mxu0 %v3688_v2  ;;  %1601 = vmatprep.subr.bf16.mxu1 %v4757_v1  ;;  %v4829_v2 = vld [vmem:[#allocation104_spill] sm:$0xff]  ;;  %v2884_v1 = vmul.f32 -1.442695, %v1037_v24  ;;  %v2885_v56 = vmul.f32 -1.442695, %v1039_v3  ;;  %v4835_v24 = vld [vmem:[#allocation13_spill] sm:$0xff] }
 0x1a0   :  { %3068 = vpow2.f32 %v2884_v1 }
 0x1a1   :  { %1561 = vmatpush2.bf16.msra.mxu0 %v3694_v30  ;;  %1602 = vmatpush2.bf16.msra.mxu1 %v3698_v58  ;;  %v4831_v30 = vld [vmem:[#allocation106_spill] sm:$0xff]  ;;  %v4065_v58 = vld [vmem:[#allocation2 + $0x18] sm:$0xff]  ;;  %3070 = vpow2.f32 %v2886_v31 }
 0x1a2   :  { %1562 = vmatprep.subr.bf16.mxu0 %v3700_v32  ;;  %1603 = vmatprep.subr.bf16.mxu1 %v4829_v2  ;;  %v2887_v32 = vmul.f32 -1.442695, %v1080_v25  ;;  %v4833_v2 = vld [vmem:[#allocation108_spill] sm:$0xff]  ;;  %3072 = vpow2.f32 %v2885_v56  ;;  %v4073_v46 = vcombine.high %v4065_v58, %v4065_v58  ;;  %v4836_v56 = vld [vmem:[#allocation14_spill] sm:$0xff] }
 0x1a4   :  { %3074 = vpow2.f32 %v2887_v32 }
 0x1a5   :  { %1563 = vmatpush2.bf16.msra.mxu0 %v4830_v49  ;;  %1604 = vmatpush2.bf16.msra.mxu1 %v3710_v55 }
 0x1a6   :  { %1564 = vmatprep.subr.bf16.mxu0 %v4831_v30  ;;  %1605 = vmatprep.subr.bf16.mxu1 %v3715_v59 }
 0x1a9   :  { %1565 = vmatpush2.bf16.msra.mxu0 %v4832_v13  ;;  %1606 = vmatpush2.bf16.msra.mxu1 %v4833_v2 }
 0x1aa   :  { %1681 = vmatprep.subr.bf16.mxu0 %v4834_v8  ;;  %1722 = vmatprep.subr.bf16.mxu1 %v4835_v24 }
 0x1ac   :  { %v1257_v3 = vpop.f32.mrf.mxu0  ;;  %1567 = vmatmul.mubr.bf16.vlgmr.msra.gmra.mxu0 %v3955_v6  ;;  %v1298_v25 = vpop.f32.mrf.mxu1  ;;  %1608 = vmatmul.mubr.bf16.vlgmr.msra.gmra.mxu1 %v3955_v6 }
 0x1ad   :  { %v1258_v1 = vadd.f32 %v1257_v3, %v4032_v38  ;;  %1682 = vmatpush1.bf16.msra.mxu0 %v3329_v5  ;;  %v1299_v31 = vadd.f32 %v1298_v25, %v4036_v39  ;;  %1723 = vmatpush1.bf16.msra.mxu1 %v4836_v56 }
 0x1ae   :  { %v1259_v8 = vpop.f32.mrf.mxu0  ;;  %1683 = vmatprep.subr.bf16.mxu0 %v3335_v10  ;;  %v1300_v2 = vpop.f32.mrf.mxu1  ;;  %1724 = vmatprep.subr.bf16.mxu1 %v3338_v14 }
 0x1af   :  { %v2894_v24 = vmul.f32 -1.442695, %v1258_v1  ;;  %v1260_v32 = vadd.f32 %v1259_v8, %v4043_v33  ;;  %1713 = vmatprep.mubr.bf16.mxu0 %v4073_v46  ;;  %v2896_v3 = vmul.f32 -1.442695, %v1299_v31  ;;  %v1301_v6 = vadd.f32 %v1300_v2, %v4047_v48  ;;  %1754 = vmatprep.mubr.bf16.mxu1 %v4073_v46  ;;  %v4843_v8 = vld [vmem:[#allocation21_spill] sm:$0xff] }
 0x1b0   :  { %v1261_v38 = vpop.f32.mrf.mxu0  ;;  %v1302_v25 = vpop.f32.mrf.mxu1 }
 0x1b1   :  { %3076 = vpow2.f32 %v2894_v24  ;;  %v2895_v5 = vmul.f32 -1.442695, %v1260_v32  ;;  %1684 = vmatpush1.bf16.msra.mxu0 %v3342_v18  ;;  %v2897_v10 = vmul.f32 -1.442695, %v1301_v6  ;;  %1725 = vmatpush1.bf16.msra.mxu1 %v3346_v19  ;;  %v3069_v38 = vpop.eup %3068  ;;  %v4844_v6 = vld [vmem:[#allocation22_spill] sm:$0xff]  ;;  %v4845_v25 = vld [vmem:[#allocation23_spill] sm:$0xff] }
 0x1b2   :  { %3078 = vpow2.f32 %v2896_v3  ;;  %v1262_v1 = vpop.f32.mrf.mxu0  ;;  %1685 = vmatprep.subr.bf16.mxu0 %v3348_v20  ;;  %v1303_v14 = vpop.f32.mrf.mxu1  ;;  %1726 = vmatprep.subr.bf16.mxu1 %v3351_v21  ;;  %v1190_v31 = vadd.f32 1.0, %v3069_v38  ;;  %v4848_v38 = vld [vmem:[#allocation27_spill] sm:$0xff] }
 0x1b3   :  { %3080 = vpow2.f32 %v2895_v5  ;;  %v3071_v18 = vpop.eup %3070  ;;  %v4846_v1 = vld [vmem:[#allocation25_spill] sm:$0xff]  ;;  %v4847_v14 = vld [vmem:[#allocation26_spill] sm:$0xff] }
 0x1b4   :  { %3082 = vpow2.f32 %v2897_v10  ;;  %v3073_v2 = vpop.eup %3072  ;;  %v1192_v20 = vadd.f32 1.0, %v3071_v18  ;;  %v4849_v18 = vld [vmem:[#allocation28_spill] sm:$0xff] }
 0x1b5   :  { %1686 = vmatpush1.bf16.msra.mxu0 %v3354_v26  ;;  %1727 = vmatpush1.bf16.msra.mxu1 %v3358_v27  ;;  %v3075_v19 = vpop.eup %3074  ;;  %v1191_v21 = vadd.f32 1.0, %v3073_v2  ;;  %3084 = vrcp.f32 %v1190_v31  ;;  %v4850_v2 = vld [vmem:[#allocation29_spill] sm:$0xff]  ;;  %v4851_v31 = vld [vmem:[#allocation30_spill] sm:$0xff] }
 0x1b6   :  { %1687 = vmatprep.subr.bf16.mxu0 %v3360_v28  ;;  %1728 = vmatprep.subr.bf16.mxu1 %v3363_v29  ;;  %v1193_v26 = vadd.f32 1.0, %v3075_v19  ;;  %3086 = vrcp.f32 %v1192_v20  ;;  %v333_v19 = vsub.s32 4, %v4013_v7  ;;  %v341_v20 = vsub.s32 6, %v4013_v7 }
 0x1b7   :  { %3088 = vrcp.f32 %v1191_v21  ;;  %v4853_v21 = vld [vmem:[#allocation32_spill] sm:$0xff] }
 0x1b8   :  { %3090 = vrcp.f32 %v1193_v26  ;;  %v337_v26 = vsub.s32 5, %v4013_v7 }
 0x1b9   :  { %1688 = vmatpush1.bf16.msra.mxu0 %v3366_v34  ;;  %1729 = vmatpush1.bf16.msra.mxu1 %v3370_v35 }
 0x1ba   :  { %1689 = vmatprep.subr.bf16.mxu0 %v3372_v36  ;;  %1730 = vmatprep.subr.bf16.mxu1 %v3375_v37 }
 0x1bd   :  { %1690 = vmatpush1.bf16.msra.mxu0 %v3378_v42  ;;  %1731 = vmatpush1.bf16.msra.mxu1 %v3382_v43  ;;  %v4837_v43 = vld [vmem:[#allocation15_spill] sm:$0xff] }
 0x1be   :  { %v3077_v27 = vpop.eup %3076  ;;  %1691 = vmatprep.subr.bf16.mxu0 %v3384_v44  ;;  %1732 = vmatprep.subr.bf16.mxu1 %v3387_v45  ;;  %v4838_v45 = vld [vmem:[#allocation16_spill] sm:$0xff] }
 0x1bf   :  { %v3079_v28 = vpop.eup %3078  ;;  %v1411_v29 = vadd.f32 1.0, %v3077_v27  ;;  %v4854_v27 = vld [vmem:[#allocation33_spill] sm:$0xff] }
 0x1c0   :  { %v3081_v34 = vpop.eup %3080  ;;  %v1413_v35 = vadd.f32 1.0, %v3079_v28  ;;  %v345_v28 = vsub.s32 7, %v4013_v7 }
 0x1c1   :  { %v3083_v36 = vpop.eup %3082  ;;  %3092 = vrcp.f32 %v1411_v29  ;;  %v1412_v37 = vadd.f32 1.0, %v3081_v34  ;;  %1692 = vmatpush1.bf16.msra.mxu0 %v3390_v50  ;;  %1733 = vmatpush1.bf16.msra.mxu1 %v3394_v51  ;;  %v4839_v51 = vld [vmem:[#allocation17_spill] sm:$0xff]  ;;  %v4160_v29 = vrot.slane %v4021_v17, %v333_v19  ;;  %v4855_v34 = vld [vmem:[#allocation34_spill] sm:$0xff] }
 0x1c2   :  { %3094 = vrcp.f32 %v1413_v35  ;;  %v1414_v42 = vadd.f32 1.0, %v3083_v36  ;;  %1693 = vmatprep.subr.bf16.mxu0 %v3396_v52  ;;  %1734 = vmatprep.subr.bf16.mxu1 %v3401_v54  ;;  %v4112_v44 = vpop.eup %3084  ;;  %v4164_v35 = vrot.slane %v4021_v17, %v341_v20  ;;  %v4856_v36 = vld [vmem:[#allocation35_spill] sm:$0xff]  ;;  %v4867_v19 = vld [vmem:[#allocation42_spill] sm:$0xff] }
 0x1c3   :  { %3096 = vrcp.f32 %v1412_v37  ;;  %v4116_v50 = vpop.eup %3086  ;;  %v4857_v37 = vld [vmem:[#allocation36_spill] sm:$0xff]  ;;  %v4868_v20 = vld [vmem:[#allocation43_spill] sm:$0xff] }
 0x1c4   :  { %3098 = vrcp.f32 %v1414_v42  ;;  %v4119_v52 = vpop.eup %3088  ;;  %v4169_v42 = vrot.slane %v4021_v17, %v337_v26  ;;  %v4870_v26 = vld [vmem:[#allocation45_spill] sm:$0xff] }
 0x1c5   :  { %1694 = vmatpush1.bf16.msra.mxu0 %v3408_v60  ;;  %1735 = vmatpush1.bf16.msra.mxu1 %v3413_v61  ;;  %v4121_v54 = vpop.eup %3090  ;;  %v4840_v60 = vld [vmem:[#allocation18_spill] sm:$0xff] }
 0x1c6   :  { %1695 = vmatprep.subr.bf16.mxu0 %v3415_v62  ;;  %1736 = vmatprep.subr.bf16.mxu1 %v3418_v63  ;;  %v4841_v62 = vld [vmem:[#allocation19_spill] sm:$0xff]  ;;  %v4842_v63 = vld [vmem:[#allocation20_spill] sm:$0xff] }
 0x1c9   :  { %1696 = vmatpush1.bf16.msra.mxu0 %v4837_v43  ;;  %1737 = vmatpush1.bf16.msra.mxu1 %v4838_v45  ;;  %v4858_v43 = vld [vmem:[#allocation37_spill] sm:$0xff]  ;;  %v4173_v45 = vrot.slane %v4021_v17, %v345_v28  ;;  %v4866_v17 = vld [vmem:[#allocation24_spill] sm:$0xff]  ;;  %v4193_v28 = vcombine.low %v4065_v58, %v4065_v58  ;;  %v4875_v58 = vld [vmem:[#allocation50_spill] sm:$0xff] }
 0x1ca   :  { %1697 = vmatprep.subr.bf16.mxu0 %v3428_v11  ;;  %1738 = vmatprep.subr.bf16.mxu1 %v4839_v51  ;;  %v4859_v51 = vld [vmem:[#allocation87_spill] sm:$0xff] }
 0x1cd   :  { %1698 = vmatpush2.bf16.msra.mxu0 %v4840_v60  ;;  %1739 = vmatpush2.bf16.msra.mxu1 %v4841_v62  ;;  %v1119_v60 = vadd.f32 %v4859_v51, %v4160_v29  ;;  %v4860_v62 = vld [vmem:[#allocation38_spill] sm:$0xff] }
 0x1ce   :  { %v4124_v61 = vpop.eup %3092  ;;  %1699 = vmatprep.subr.bf16.mxu0 %v4842_v63  ;;  %1740 = vmatprep.subr.bf16.mxu1 %v4843_v8  ;;  %v4861_v63 = vld [vmem:[#allocation89_spill] sm:$0xff] }
 0x1cf   :  { %v4128_v56 = vpop.eup %3094  ;;  %v1435_v11 = vmax.f32 %v4112_v44, %v4124_v61  ;;  %v1160_v8 = vadd.f32 %v4861_v63, %v4164_v35 }
 0x1d0   :  { %v4133_v24 = vpop.eup %3096  ;;  %v1437_v32 = vmax.f32 %v4116_v50, %v4128_v56  ;;  %v182_v50 = vld [vmem:[#allocation5 + $0x400] sm:$0xff] }
 0x1d1   :  { %v4137_v3 = vpop.eup %3098  ;;  %1700 = vmatpush2.bf16.msra.mxu0 %v4844_v6  ;;  %v1436_v5 = vmax.f32 %v4119_v52, %v4133_v24  ;;  %1741 = vmatpush2.bf16.msra.mxu1 %v4845_v25  ;;  %v4862_v6 = vld [vmem:[#allocation39_spill] sm:$0xff]  ;;  %v4863_v25 = vld [vmem:[#allocation40_spill] sm:$0xff] }
 0x1d2   :  { %1701 = vmatprep.subr.bf16.mxu0 %v4761_v41  ;;  %v1438_v10 = vmax.f32 %v4121_v54, %v4137_v3  ;;  %1742 = vmatprep.subr.bf16.mxu1 %v4846_v1  ;;  %v4852_v41 = vld [vmem:[#allocation31_spill] sm:$0xff]  ;;  %v186_v56 = vld [vmem:[#allocation5 + $0x420] sm:$0xff] }
 0x1d3   :  { %v4864_v1 = vld [vmem:[#allocation95_spill] sm:$0xff]  ;;  %v2923_v24 = vcombine.high %v182_v50, %v186_v56  ;;  %v302_v54 = vld [vmem:[#allocation5 + $0x7c0] sm:$0xff] }
 0x1d4   :  { %v306_v3 = vld [vmem:[#allocation5 + $0x7e0] sm:$0xff] }
 0x1d5   :  { %1702 = vmatpush2.bf16.msra.mxu0 %v4847_v14  ;;  %1743 = vmatpush2.bf16.msra.mxu1 %v4848_v38  ;;  %v1121_v14 = vadd.f32 %v4864_v1, %v4169_v42  ;;  %v4865_v38 = vld [vmem:[#allocation41_spill] sm:$0xff] }
 0x1d6   :  { %1703 = vmatprep.subr.bf16.mxu0 %v4849_v18  ;;  %1744 = vmatprep.subr.bf16.mxu1 %v4850_v2  ;;  %v1162_v18 = vadd.f32 %v4866_v17, %v4173_v45  ;;  %v2888_v2 = vmul.f32 -1.442695, %v1119_v60  ;;  %v4878_v17 = vld [vmem:[#allocation53_spill] sm:$0xff] }
 0x1d8   :  { %3100 = vpow2.f32 %v2888_v2 }
 0x1d9   :  { %1704 = vmatpush2.bf16.msra.mxu0 %v4851_v31  ;;  %1745 = vmatpush2.bf16.msra.mxu1 %v4852_v41  ;;  %v2890_v31 = vmul.f32 -1.442695, %v1160_v8  ;;  %v4869_v41 = vld [vmem:[#allocation44_spill] sm:$0xff]  ;;  %v4876_v8 = vld [vmem:[#allocation51_spill] sm:$0xff] }
 0x1da   :  { %1705 = vmatprep.subr.bf16.mxu0 %v4853_v21  ;;  %1746 = vmatprep.subr.bf16.mxu1 %v4854_v27  ;;  %v2889_v21 = vmul.f32 -1.442695, %v1121_v14  ;;  %v2891_v27 = vmul.f32 -1.442695, %v1162_v18 }
 0x1db   :  { %3102 = vpow2.f32 %v2890_v31 }
 0x1dc   :  { %3104 = vpow2.f32 %v2889_v21 }
 0x1dd   :  { %1706 = vmatpush2.bf16.msra.mxu0 %v4855_v34  ;;  %1747 = vmatpush2.bf16.msra.mxu1 %v4856_v36  ;;  %v4871_v34 = vld [vmem:[#allocation46_spill] sm:$0xff]  ;;  %v4872_v36 = vld [vmem:[#allocation47_spill] sm:$0xff]  ;;  %3106 = vpow2.f32 %v2891_v27  ;;  %v4880_v27 = vld [vmem:[#allocation56_spill] sm:$0xff] }
 0x1de   :  { %1707 = vmatprep.subr.bf16.mxu0 %v4857_v37  ;;  %1748 = vmatprep.subr.bf16.mxu1 %v4858_v43  ;;  %v4873_v37 = vld [vmem:[#allocation48_spill] sm:$0xff]  ;;  %v4874_v43 = vld [vmem:[#allocation49_spill] sm:$0xff] }
 0x1e1   :  { %1708 = vmatpush2.bf16.msra.mxu0 %v4860_v62  ;;  %1749 = vmatpush2.bf16.msra.mxu1 %v4862_v6 }
 0x1e2   :  { %1709 = vmatprep.subr.bf16.mxu0 %v4863_v25  ;;  %1750 = vmatprep.subr.bf16.mxu1 %v4865_v38  ;;  %v4877_v25 = vld [vmem:[#allocation52_spill] sm:$0xff] }
 0x1e5   :  { %1710 = vmatpush2.bf16.msra.mxu0 %v4867_v19  ;;  %1751 = vmatpush2.bf16.msra.mxu1 %v4868_v20 }
 0x1e6   :  { %1711 = vmatprep.subr.bf16.mxu0 %v4869_v41  ;;  %1752 = vmatprep.subr.bf16.mxu1 %v4870_v26  ;;  %v4879_v41 = vld [vmem:[#allocation54_spill] sm:$0xff] }
 0x1e9   :  { %1712 = vmatpush2.bf16.msra.mxu0 %v4871_v34  ;;  %1753 = vmatpush2.bf16.msra.mxu1 %v4872_v36  ;;  %v4881_v36 = vld [vmem:[#allocation57_spill] sm:$0xff] }
 0x1ea   :  { %1763 = vmatprep.subr.bf16.mxu0 %v4873_v37  ;;  %1804 = vmatprep.subr.bf16.mxu1 %v4874_v43  ;;  %v4882_v37 = vld [vmem:[#allocation58_spill] sm:$0xff]  ;;  %v4883_v43 = vld [vmem:[#allocation59_spill] sm:$0xff] }
 0x1ec   :  { %v1339_v51 = vpop.f32.mrf.mxu0  ;;  %1714 = vmatmul.mubr.bf16.vlgmr.msra.gmra.mxu0 %v4193_v28  ;;  %v1380_v62 = vpop.f32.mrf.mxu1  ;;  %1755 = vmatmul.mubr.bf16.vlgmr.msra.gmra.mxu1 %v4193_v28 }
 0x1ed   :  { %v1340_v60 = vadd.f32 %v1339_v51, %v4160_v29  ;;  %1764 = vmatpush1.bf16.msra.mxu0 %v4875_v58  ;;  %v1381_v63 = vadd.f32 %v1380_v62, %v4164_v35  ;;  %1805 = vmatpush1.bf16.msra.mxu1 %v4876_v8  ;;  %v4884_v51 = vld [vmem:[#allocation60_spill] sm:$0xff]  ;;  %v4885_v62 = vld [vmem:[#allocation61_spill] sm:$0xff]  ;;  %v4886_v8 = vld [vmem:[#allocation62_spill] sm:$0xff] }
 0x1ee   :  { %v1341_v6 = vpop.f32.mrf.mxu0  ;;  %1765 = vmatprep.subr.bf16.mxu0 %v4877_v25  ;;  %v1382_v38 = vpop.f32.mrf.mxu1  ;;  %1806 = vmatprep.subr.bf16.mxu1 %v4878_v17  ;;  %v4887_v25 = vld [vmem:[#allocation63_spill] sm:$0xff] }
 0x1ef   :  { %v2898_v1 = vmul.f32 -1.442695, %v1340_v60  ;;  %v1342_v14 = vadd.f32 %v1341_v6, %v4169_v42  ;;  %1795 = vmatprep.mubr.bf16.mxu0 %v4073_v46  ;;  %v2900_v18 = vmul.f32 -1.442695, %v1381_v63  ;;  %v1383_v2 = vadd.f32 %v1382_v38, %v4173_v45  ;;  %1836 = vmatprep.mubr.bf16.mxu1 %v4073_v46  ;;  %v3101_v46 = vpop.eup %3100  ;;  %v4889_v38 = vld [vmem:[#allocation65_spill] sm:$0xff] }
 0x1f0   :  { %v1343_v19 = vpop.f32.mrf.mxu0  ;;  %v1384_v20 = vpop.f32.mrf.mxu1  ;;  %v1194_v63 = vadd.f32 1.0, %v3101_v46 }
 0x1f1   :  { %3108 = vpow2.f32 %v2898_v1  ;;  %v2899_v31 = vmul.f32 -1.442695, %v1342_v14  ;;  %1766 = vmatpush1.bf16.msra.mxu0 %v4879_v41  ;;  %v2901_v21 = vmul.f32 -1.442695, %v1383_v2  ;;  %1807 = vmatpush1.bf16.msra.mxu1 %v4794_v23  ;;  %v3103_v60 = vpop.eup %3102  ;;  %v4888_v1 = vld [vmem:[#allocation64_spill] sm:$0xff]  ;;  %v4891_v19 = vld [vmem:[#allocation67_spill] sm:$0xff] }
 0x1f2   :  { %3110 = vpow2.f32 %v2900_v18  ;;  %v1344_v26 = vpop.f32.mrf.mxu0  ;;  %1767 = vmatprep.subr.bf16.mxu0 %v4880_v27  ;;  %v1385_v34 = vpop.f32.mrf.mxu1  ;;  %1808 = vmatprep.subr.bf16.mxu1 %v4881_v36  ;;  %v1196_v6 = vadd.f32 1.0, %v3103_v60  ;;  %v4890_v18 = vld [vmem:[#allocation66_spill] sm:$0xff]  ;;  %v4897_v60 = vld [vmem:[#allocation73_spill] sm:$0xff] }
 0x1f3   :  { %3112 = vpow2.f32 %v2899_v31  ;;  %v3105_v58 = vpop.eup %3104  ;;  %v4892_v31 = vld [vmem:[#allocation68_spill] sm:$0xff] }
 0x1f4   :  { %3114 = vpow2.f32 %v2901_v21  ;;  %v3107_v23 = vpop.eup %3106  ;;  %v1195_v14 = vadd.f32 1.0, %v3105_v58  ;;  %v4893_v21 = vld [vmem:[#allocation69_spill] sm:$0xff]  ;;  %v4899_v58 = vld [vmem:[#allocation75_spill] sm:$0xff] }
 0x1f5   :  { %1768 = vmatpush1.bf16.msra.mxu0 %v4882_v37  ;;  %1809 = vmatpush1.bf16.msra.mxu1 %v4883_v43  ;;  %v1197_v17 = vadd.f32 1.0, %v3107_v23  ;;  %3116 = vrcp.f32 %v1194_v63  ;;  %v4894_v37 = vld [vmem:[#allocation70_spill] sm:$0xff]  ;;  %v4895_v43 = vld [vmem:[#allocation71_spill] sm:$0xff]  ;;  %v4900_v23 = vld [vmem:[#allocation76_spill] sm:$0xff] }
 0x1f6   :  { %1769 = vmatprep.subr.bf16.mxu0 %v4884_v51  ;;  %1810 = vmatprep.subr.bf16.mxu1 %v4885_v62  ;;  %3118 = vrcp.f32 %v1196_v6  ;;  %v4896_v51 = vld [vmem:[#allocation72_spill] sm:$0xff]  ;;  %v4898_v62 = vld [vmem:[#allocation74_spill] sm:$0xff] }
 0x1f7   :  { %3120 = vrcp.f32 %v1195_v14 }
 0x1f8   :  { %3122 = vrcp.f32 %v1197_v17 }
 0x1f9   :  { %1770 = vmatpush1.bf16.msra.mxu0 %v4886_v8  ;;  %1811 = vmatpush1.bf16.msra.mxu1 %v4887_v25  ;;  %v4901_v8 = vld [vmem:[#allocation80_spill] sm:$0xff]  ;;  %v4902_v25 = vld [vmem:[#allocation81_spill] sm:$0xff] }
 0x1fa   :  { %1771 = vmatprep.subr.bf16.mxu0 %v4888_v1  ;;  %1812 = vmatprep.subr.bf16.mxu1 %v4889_v38 }
 0x1fd   :  { %1772 = vmatpush1.bf16.msra.mxu0 %v4890_v18  ;;  %1813 = vmatpush1.bf16.msra.mxu1 %v4891_v19 }
 0x1fe   :  { %v3109_v2 = vpop.eup %3108  ;;  %1773 = vmatprep.subr.bf16.mxu0 %v4892_v31  ;;  %1814 = vmatprep.subr.bf16.mxu1 %v4893_v21  ;;  %v4906_v31 = vld [vmem:[#allocation91_spill] sm:$0xff]  ;;  %v4909_v21 = vld [vmem:[#allocation94_spill] sm:$0xff] }
 0x1ff   :  { %v3111_v20 = vpop.eup %3110  ;;  %v1415_v41 = vadd.f32 1.0, %v3109_v2 }
 0x200   :  { %v3113_v26 = vpop.eup %3112  ;;  %v1417_v27 = vadd.f32 1.0, %v3111_v20  ;;  %v4907_v20 = vld [vmem:[#allocation92_spill] sm:$0xff] }
 0x201   :  { %v3115_v34 = vpop.eup %3114  ;;  %3124 = vrcp.f32 %v1415_v41  ;;  %v1416_v36 = vadd.f32 1.0, %v3113_v26  ;;  %1774 = vmatpush1.bf16.msra.mxu0 %v4894_v37  ;;  %1815 = vmatpush1.bf16.msra.mxu1 %v4895_v43  ;;  %v4908_v41 = vld [vmem:[#allocation93_spill] sm:$0xff]  ;;  %v4917_v37 = vld [vmem:[#allocation103_spill] sm:$0xff]  ;;  %v242_v43 = vld [vmem:[#allocation5 + $0x5e0] sm:$0xff] }
 0x202   :  { %3126 = vrcp.f32 %v1417_v27  ;;  %v1418_v46 = vadd.f32 1.0, %v3115_v34  ;;  %1775 = vmatprep.subr.bf16.mxu0 %v4896_v51  ;;  %1816 = vmatprep.subr.bf16.mxu1 %v4897_v60  ;;  %v4236_v63 = vpop.eup %3116  ;;  %v4911_v26 = vld [vmem:[#allocation97_spill] sm:$0xff]  ;;  %v4912_v27 = vld [vmem:[#allocation98_spill] sm:$0xff] }
 0x203   :  { %3128 = vrcp.f32 %v1416_v36  ;;  %v4240_v6 = vpop.eup %3118  ;;  %v4915_v34 = vld [vmem:[#allocation101_spill] sm:$0xff]  ;;  %v4916_v36 = vld [vmem:[#allocation102_spill] sm:$0xff] }
 0x204   :  { %3130 = vrcp.f32 %v1418_v46  ;;  %v4243_v1 = vpop.eup %3120  ;;  %v4918_v46 = vld [vmem:[#allocation104_spill] sm:$0xff]  ;;  %v239_v51 = vld [vmem:[#allocation5 + $0x5c8] sm:$0xff] }
 0x205   :  { %1776 = vmatpush1.bf16.msra.mxu0 %v4898_v62  ;;  %1817 = vmatpush1.bf16.msra.mxu1 %v4899_v58  ;;  %v4245_v14 = vpop.eup %3122  ;;  %v243_v60 = vld [vmem:[#allocation5 + $0x5e8] sm:$0xff]  ;;  %v230_v58 = vld [vmem:[#allocation5 + $0x580] sm:$0xff] }
 0x206   :  { %1777 = vmatprep.subr.bf16.mxu0 %v4900_v23  ;;  %1818 = vmatprep.subr.bf16.mxu1 %v4816_v16  ;;  %v2981_v62 = vcombine.high %v239_v51, %v243_v60  ;;  %v234_v23 = vld [vmem:[#allocation5 + $0x5a0] sm:$0xff] }
 0x209   :  { %1778 = vmatpush1.bf16.msra.mxu0 %v4817_v9  ;;  %1819 = vmatpush1.bf16.msra.mxu1 %v4818_v40  ;;  %v4903_v40 = vld [vmem:[#allocation85_spill] sm:$0xff] }
 0x20a   :  { %1779 = vmatprep.subr.bf16.mxu0 %v4901_v8  ;;  %1820 = vmatprep.subr.bf16.mxu1 %v4902_v25  ;;  %v231_v8 = vld [vmem:[#allocation5 + $0x588] sm:$0xff] }
 0x20b   :  { %v235_v25 = vld [vmem:[#allocation5 + $0x5a8] sm:$0xff] }
 0x20d   :  { %1780 = vmatpush2.bf16.msra.mxu0 %v4821_v12  ;;  %1821 = vmatpush2.bf16.msra.mxu1 %v4822_v22  ;;  %v4904_v12 = vld [vmem:[#allocation86_spill] sm:$0xff] }
 0x20e   :  { %v4248_v38 = vpop.eup %3124  ;;  %1781 = vmatprep.subr.bf16.mxu0 %v4823_v53  ;;  %1822 = vmatprep.subr.bf16.mxu1 %v4903_v40  ;;  %v4905_v53 = vld [vmem:[#allocation88_spill] sm:$0xff] }
 0x20f   :  { %v4252_v16 = vpop.eup %3126  ;;  %v1439_v9 = vmax.f32 %v4236_v63, %v4248_v38 }
 0x210   :  { %v4257_v17 = vpop.eup %3128  ;;  %v1441_v18 = vmax.f32 %v4240_v6, %v4252_v16  ;;  %v246_v6 = vld [vmem:[#allocation5 + $0x600] sm:$0xff] }
 0x211   :  { %v4261_v2 = vpop.eup %3130  ;;  %1782 = vmatpush2.bf16.msra.mxu0 %v4904_v12  ;;  %v1440_v22 = vmax.f32 %v4243_v1, %v4257_v17  ;;  %1823 = vmatpush2.bf16.msra.mxu1 %v4746_v0  ;;  %v4910_v0 = vld [vmem:[#allocation96_spill] sm:$0xff] }
 0x212   :  { %1783 = vmatprep.subr.bf16.mxu0 %v4905_v53  ;;  %v1442_v19 = vmax.f32 %v4245_v14, %v4261_v2  ;;  %1824 = vmatprep.subr.bf16.mxu1 %v4748_v47  ;;  %v4913_v47 = vld [vmem:[#allocation99_spill] sm:$0xff]  ;;  %v4919_v12 = vld [vmem:[#allocation108_spill] sm:$0xff]  ;;  %v2980_v53 = vcombine.low %v239_v51, %v243_v60  ;;  %v4343_v14 = vld [vmem:[#allocation5 + $0x5d0] sm:$0xff] }
 0x213   :  { %v250_v16 = vld [vmem:[#allocation5 + $0x620] sm:$0xff]  ;;  %v4345_v2 = vld [vmem:[#allocation5 + $0x5f0] sm:$0xff] }
 0x214   :  { %v2987_v17 = vcombine.high %v246_v6, %v250_v16 }
 0x215   :  { %1784 = vmatpush2.bf16.msra.mxu0 %v4826_v57  ;;  %1825 = vmatpush2.bf16.msra.mxu1 %v4906_v31  ;;  %v4914_v57 = vld [vmem:[#allocation100_spill] sm:$0xff] }
 0x216   :  { %1785 = vmatprep.subr.bf16.mxu0 %v4907_v20  ;;  %1826 = vmatprep.subr.bf16.mxu1 %v4908_v41 }
 0x219   :  { %1786 = vmatpush2.bf16.msra.mxu0 %v4909_v21  ;;  %1827 = vmatpush2.bf16.msra.mxu1 %v4754_v15  ;;  %v238_v15 = vld [vmem:[#allocation5 + $0x5c0] sm:$0xff] }
 0x21a   :  { %1787 = vmatprep.subr.bf16.mxu0 %v4910_v0  ;;  %1828 = vmatprep.subr.bf16.mxu1 %v4911_v26  ;;  %v2978_v40 = vcombine.low %v238_v15, %v242_v43 }
 0x21d   :  { %1788 = vmatpush2.bf16.msra.mxu0 %v3682_v4  ;;  %1829 = vmatpush2.bf16.msra.mxu1 %v4912_v27  ;;  %v2979_v4 = vcombine.high %v238_v15, %v242_v43  ;;  %v222_v27 = vld [vmem:[#allocation5 + $0x540] sm:$0xff]  ;;  %v2970_v43 = vcombine.low %v230_v58, %v234_v23 }
 0x21e   :  { %1789 = vmatprep.subr.bf16.mxu0 %v4913_v47  ;;  %1830 = vmatprep.subr.bf16.mxu1 %v4914_v57  ;;  %v226_v47 = vld [vmem:[#allocation5 + $0x560] sm:$0xff] }
 0x221   :  { %1790 = vmatpush2.bf16.msra.mxu0 %v4915_v34  ;;  %1831 = vmatpush2.bf16.msra.mxu1 %v4916_v36 }
 0x222   :  { %1791 = vmatprep.subr.bf16.mxu0 %v4917_v37  ;;  %1832 = vmatprep.subr.bf16.mxu1 %v4918_v46  ;;  %v223_v37 = vld [vmem:[#allocation5 + $0x548] sm:$0xff] }
 0x223   :  { %v227_v46 = vld [vmem:[#allocation5 + $0x568] sm:$0xff] }
 0x225   :  { %1792 = vmatpush2.bf16.msra.mxu0 %v4830_v49  ;;  %1833 = vmatpush2.bf16.msra.mxu1 %v3710_v55  ;;  %v2971_v49 = vcombine.high %v230_v58, %v234_v23  ;;  %v2973_v55 = vcombine.high %v231_v8, %v235_v25 }
 0x226   :  { %1793 = vmatprep.subr.bf16.mxu0 %v4831_v30  ;;  %1834 = vmatprep.subr.bf16.mxu1 %v3715_v59  ;;  %v4920_v30 = vld [vmem:[#allocation55_spill] sm:$0xff] }
 0x229   :  { %1794 = vmatpush2.bf16.msra.mxu0 %v4832_v13  ;;  %1835 = vmatpush2.bf16.msra.mxu1 %v4919_v12  ;;  %v2965_v12 = vcombine.high %v223_v37, %v227_v46 }
 0x22a   :  { %2560 = vmatprep.subr.bf16.mxu0 %v2979_v4  ;;  %2601 = vmatprep.subr.bf16.mxu1 %v2981_v62  ;;  %v2972_v4 = vcombine.low %v231_v8, %v235_v25  ;;  %v2963_v62 = vcombine.high %v222_v27, %v226_v47 }
 0x22c   :  { %v1486_v31 = vpop.f32.mrf.mxu0  ;;  %1796 = vmatmul.mubr.bf16.vlgmr.msra.gmra.mxu0 %v4193_v28  ;;  %v1527_v20 = vpop.f32.mrf.mxu1  ;;  %1837 = vmatmul.mubr.bf16.vlgmr.msra.gmra.mxu1 %v4193_v28 }
 0x22d   :  { %v1487_v59 = vadd.f32 %v1486_v31, %v4920_v30  ;;  %2561 = vmatpush1.bf16.xpose.msra.mxu0 %v2978_v40  ;;  %v1528_v41 = vadd.f32 %v1527_v20, %v4036_v39  ;;  %2602 = vmatpush1.bf16.xpose.msra.mxu1 %v2980_v53  ;;  %v214_v53 = vld [vmem:[#allocation5 + $0x500] sm:$0xff]  ;;  %v219_v31 = vld [vmem:[#allocation5 + $0x528] sm:$0xff]  ;;  %v2964_v20 = vcombine.low %v223_v37, %v227_v46 }
 0x22e   :  { %v1488_v13 = vpop.f32.mrf.mxu0  ;;  %2562 = vmatprep.subr.bf16.mxu0 %v2971_v49  ;;  %v1529_v26 = vpop.f32.mrf.mxu1  ;;  %2603 = vmatprep.subr.bf16.mxu1 %v2973_v55  ;;  %v218_v49 = vld [vmem:[#allocation5 + $0x520] sm:$0xff]  ;;  %v215_v55 = vld [vmem:[#allocation5 + $0x508] sm:$0xff] }
 0x22f   :  { %v2904_v21 = vmul.f32 -1.442695, %v1487_v59  ;;  %v1489_v0 = vadd.f32 %v1488_v13, %v4043_v33  ;;  %v2906_v57 = vmul.f32 -1.442695, %v1528_v41  ;;  %v1530_v34 = vadd.f32 %v1529_v26, %v4047_v48  ;;  %v206_v13 = vld [vmem:[#allocation5 + $0x4c0] sm:$0xff] }
 0x230   :  { %v1490_v36 = vpop.f32.mrf.mxu0  ;;  %v1531_v15 = vpop.f32.mrf.mxu1  ;;  %v2962_v59 = vcombine.low %v222_v27, %v226_v47  ;;  %v2955_v58 = vcombine.high %v214_v53, %v218_v49  ;;  %v2957_v23 = vcombine.high %v215_v55, %v219_v31  ;;  %v2954_v27 = vcombine.low %v214_v53, %v218_v49 }
 0x231   :  { %3132 = vpow2.f32 %v2904_v21  ;;  %v2905_v28 = vmul.f32 -1.442695, %v1489_v0  ;;  %v2907_v51 = vmul.f32 -1.442695, %v1530_v34  ;;  %v210_v21 = vld [vmem:[#allocation5 + $0x4e0] sm:$0xff]  ;;  %v211_v34 = vld [vmem:[#allocation5 + $0x4e8] sm:$0xff]  ;;  %v2956_v37 = vcombine.low %v215_v55, %v219_v31 }
 0x232   :  { %3134 = vpow2.f32 %v2906_v57  ;;  %v1491_v60 = vpop.f32.mrf.mxu0  ;;  %v1532_v40 = vpop.f32.mrf.mxu1  ;;  %v207_v57 = vld [vmem:[#allocation5 + $0x4c8] sm:$0xff]  ;;  %v2947_v46 = vcombine.high %v206_v13, %v210_v21  ;;  %v190_v55 = vld [vmem:[#allocation5 + $0x440] sm:$0xff] }
 0x233   :  { %3136 = vpow2.f32 %v2905_v28  ;;  %v2949_v15 = vcombine.high %v207_v57, %v211_v34  ;;  %v199_v60 = vld [vmem:[#allocation5 + $0x488] sm:$0xff]  ;;  %v2948_v40 = vcombine.low %v207_v57, %v211_v34  ;;  %v194_v31 = vld [vmem:[#allocation5 + $0x460] sm:$0xff] }
 0x234   :  { %3138 = vpow2.f32 %v2907_v51  ;;  %v202_v51 = vld [vmem:[#allocation5 + $0x4a0] sm:$0xff]  ;;  %v2930_v57 = vcombine.low %v190_v55, %v194_v31  ;;  %v307_v34 = vld [vmem:[#allocation5 + $0x7e8] sm:$0xff] }
 0x235   :  { %2563 = vmatpush1.bf16.xpose.msra.mxu0 %v2970_v43  ;;  %2604 = vmatpush1.bf16.xpose.msra.mxu1 %v2972_v4  ;;  %v198_v43 = vld [vmem:[#allocation5 + $0x480] sm:$0xff]  ;;  %v203_v4 = vld [vmem:[#allocation5 + $0x4a8] sm:$0xff] }
 0x236   :  { %2564 = vmatprep.subr.bf16.mxu0 %v2963_v62  ;;  %2605 = vmatprep.subr.bf16.mxu1 %v2965_v12  ;;  %v2946_v62 = vcombine.low %v206_v13, %v210_v21  ;;  %v2939_v12 = vcombine.high %v198_v43, %v202_v51  ;;  %v2938_v13 = vcombine.low %v198_v43, %v202_v51  ;;  %v299_v43 = vld [vmem:[#allocation5 + $0x7a8] sm:$0xff] }
 0x237   :  { %v3042_v51 = vcombine.low %v302_v54, %v306_v3 }
 0x23d   :  { %2565 = vmatpush1.bf16.xpose.msra.mxu0 %v2962_v59  ;;  %2606 = vmatpush1.bf16.xpose.msra.mxu1 %v2964_v20  ;;  %v2941_v59 = vcombine.high %v199_v60, %v203_v4 }
 0x23e   :  { %v3133_v41 = vpop.eup %3132  ;;  %2566 = vmatprep.subr.bf16.mxu0 %v2955_v58  ;;  %2607 = vmatprep.subr.bf16.mxu1 %v2957_v23  ;;  %v191_v23 = vld [vmem:[#allocation5 + $0x448] sm:$0xff] }
 0x23f   :  { %v3135_v8 = vpop.eup %3134  ;;  %v1640_v25 = vadd.f32 1.0, %v3133_v41  ;;  %v195_v41 = vld [vmem:[#allocation5 + $0x468] sm:$0xff] }
 0x240   :  { %v3137_v0 = vpop.eup %3136  ;;  %v1642_v26 = vadd.f32 1.0, %v3135_v8  ;;  %v2933_v61 = vcombine.high %v191_v23, %v195_v41  ;;  %v2932_v52 = vcombine.low %v191_v23, %v195_v41  ;;  %v286_v23 = vld [vmem:[#allocation5 + $0x740] sm:$0xff] }
 0x241   :  { %v3139_v36 = vpop.eup %3138  ;;  %3140 = vrcp.f32 %v1640_v25  ;;  %v1641_v28 = vadd.f32 1.0, %v3137_v0  ;;  %v2940_v0 = vcombine.low %v199_v60, %v203_v4  ;;  %v290_v41 = vld [vmem:[#allocation5 + $0x760] sm:$0xff] }
 0x242   :  { %3142 = vrcp.f32 %v1642_v26  ;;  %v1643_v47 = vadd.f32 1.0, %v3139_v36  ;;  %v2931_v26 = vcombine.high %v190_v55, %v194_v31  ;;  %v2922_v36 = vcombine.low %v182_v50, %v186_v56 }
 0x243   :  { %3144 = vrcp.f32 %v1641_v28 }
 0x244   :  { %3146 = vrcp.f32 %v1643_v47 }
 0x245   :  { %2567 = vmatpush1.bf16.xpose.msra.mxu0 %v2954_v27  ;;  %2608 = vmatpush1.bf16.xpose.msra.mxu1 %v2956_v37  ;;  %v3043_v27 = vcombine.high %v302_v54, %v306_v3  ;;  %v294_v37 = vld [vmem:[#allocation5 + $0x780] sm:$0xff] }
 0x246   :  { %2568 = vmatprep.subr.bf16.mxu0 %v2947_v46  ;;  %2609 = vmatprep.subr.bf16.mxu1 %v2949_v15  ;;  %v298_v46 = vld [vmem:[#allocation5 + $0x7a0] sm:$0xff]  ;;  %v295_v15 = vld [vmem:[#allocation5 + $0x788] sm:$0xff] }
 0x247   :  { %v3035_v4 = vcombine.high %v294_v37, %v298_v46  ;;  %v278_v3 = vld [vmem:[#allocation5 + $0x700] sm:$0xff] }
 0x24d   :  { %2569 = vmatpush1.bf16.xpose.msra.mxu0 %v2946_v62  ;;  %2610 = vmatpush1.bf16.xpose.msra.mxu1 %v2948_v40  ;;  %v3037_v62 = vcombine.high %v295_v15, %v299_v43 }
 0x24e   :  { %v3141_v53 = vpop.eup %3140  ;;  %2570 = vmatprep.subr.bf16.mxu0 %v2939_v12  ;;  %2611 = vmatprep.subr.bf16.mxu1 %v2941_v59 }
 0x24f   :  { %v3143_v49 = vpop.eup %3142  ;;  %v4302_v20 = vmax.f32 %v1435_v11, %v3141_v53  ;;  %v183_v11 = vld [vmem:[#allocation5 + $0x408] sm:$0xff] }
 0x250   :  { %v3145_v58 = vpop.eup %3144  ;;  %v4307_v8 = vmax.f32 %v1437_v32, %v3143_v49  ;;  %v187_v32 = vld [vmem:[#allocation5 + $0x428] sm:$0xff] }
 0x251   :  { %v3147_v25 = vpop.eup %3146  ;;  %v4312_v21 = vmax.f32 %v1436_v5, %v3145_v58  ;;  %v2925_v5 = vcombine.high %v183_v11, %v187_v32  ;;  %v2924_v28 = vcombine.low %v183_v11, %v187_v32  ;;  %v3034_v11 = vcombine.low %v294_v37, %v298_v46 }
 0x252   :  { %v4317_v44 = vmax.f32 %v1438_v10, %v3147_v25  ;;  %v303_v10 = vld [vmem:[#allocation5 + $0x7c8] sm:$0xff] }
 0x253   :  { %v3045_v47 = vcombine.high %v303_v10, %v307_v34  ;;  %v3044_v60 = vcombine.low %v303_v10, %v307_v34  ;;  %v282_v10 = vld [vmem:[#allocation5 + $0x720] sm:$0xff]  ;;  %v279_v34 = vld [vmem:[#allocation5 + $0x708] sm:$0xff] }
 0x255   :  { %2571 = vmatpush1.bf16.xpose.msra.mxu0 %v2938_v13  ;;  %2612 = vmatpush1.bf16.xpose.msra.mxu1 %v2940_v0 }
 0x256   :  { %2572 = vmatprep.subr.bf16.mxu0 %v2931_v26  ;;  %2613 = vmatprep.subr.bf16.mxu1 %v2933_v61  ;;  %v287_v26 = vld [vmem:[#allocation5 + $0x748] sm:$0xff] }
 0x257   :  { %v291_v61 = vld [vmem:[#allocation5 + $0x768] sm:$0xff] }
 0x258   :  { %v3029_v54 = vcombine.high %v287_v26, %v291_v61 }
 0x25d   :  { %2573 = vmatpush1.bf16.xpose.msra.mxu0 %v2930_v57  ;;  %2614 = vmatpush1.bf16.xpose.msra.mxu1 %v2932_v52  ;;  %v3036_v52 = vcombine.low %v295_v15, %v299_v43 }
 0x25e   :  { %2574 = vmatprep.subr.bf16.mxu0 %v2923_v24  ;;  %2615 = vmatprep.subr.bf16.mxu1 %v2925_v5  ;;  %v3027_v24 = vcombine.high %v286_v23, %v290_v41 }
 0x265   :  { %2575 = vmatpush1.bf16.xpose.msra.mxu0 %v2922_v36  ;;  %2616 = vmatpush1.bf16.xpose.msra.mxu1 %v2924_v28  ;;  %v283_v36 = vld [vmem:[#allocation5 + $0x728] sm:$0xff]  ;;  %v3026_v28 = vcombine.low %v286_v23, %v290_v41  ;;  %v262_v41 = vld [vmem:[#allocation5 + $0x680] sm:$0xff] }
 0x266   :  { %2576 = vmatprep.subr.bf16.mxu0 %v3043_v27  ;;  %2617 = vmatprep.subr.bf16.mxu1 %v3045_v47  ;;  %v3028_v27 = vcombine.low %v287_v26, %v291_v61  ;;  %v3019_v47 = vcombine.high %v278_v3, %v282_v10  ;;  %v3021_v37 = vcombine.high %v279_v34, %v283_v36 }
 0x26c   :  { %v1568_v40 = vpop.f32.mrf.mxu0  ;;  %v1609_v59 = vpop.f32.mrf.mxu1 }
 0x26d   :  { %v1569_v12 = vadd.f32 %v1568_v40, %v4160_v29  ;;  %2577 = vmatpush2.bf16.xpose.msra.mxu0 %v3042_v51  ;;  %v1610_v53 = vadd.f32 %v1609_v59, %v4164_v35  ;;  %2618 = vmatpush2.bf16.xpose.msra.mxu1 %v3044_v60  ;;  %v270_v51 = vld [vmem:[#allocation5 + $0x6c0] sm:$0xff]  ;;  %v271_v40 = vld [vmem:[#allocation5 + $0x6c8] sm:$0xff] }
 0x26e   :  { %v1570_v49 = vpop.f32.mrf.mxu0  ;;  %2578 = vmatprep.subr.bf16.mxu0 %v3035_v4  ;;  %v1611_v58 = vpop.f32.mrf.mxu1  ;;  %2619 = vmatprep.subr.bf16.mxu1 %v3037_v62  ;;  %v274_v60 = vld [vmem:[#allocation5 + $0x6e0] sm:$0xff] }
 0x26f   :  { %v2908_v55 = vmul.f32 -1.442695, %v1569_v12  ;;  %v1571_v31 = vadd.f32 %v1570_v49, %v4169_v42  ;;  %v2910_v25 = vmul.f32 -1.442695, %v1610_v53  ;;  %v1612_v13 = vadd.f32 %v1611_v58, %v4173_v45  ;;  %v275_v12 = vld [vmem:[#allocation5 + $0x6e8] sm:$0xff] }
 0x270   :  { %v1572_v0 = vpop.f32.mrf.mxu0  ;;  %v1613_v56 = vpop.f32.mrf.mxu1  ;;  %v3018_v49 = vcombine.low %v278_v3, %v282_v10  ;;  %v3011_v58 = vcombine.high %v270_v51, %v274_v60  ;;  %v3013_v23 = vcombine.high %v271_v40, %v275_v12  ;;  %v3010_v26 = vcombine.low %v270_v51, %v274_v60  ;;  %v259_v3 = vld [vmem:[#allocation5 + $0x668] sm:$0xff] }
 0x271   :  { %3148 = vpow2.f32 %v2908_v55  ;;  %v2909_v50 = vmul.f32 -1.442695, %v1571_v31  ;;  %v2911_v32 = vmul.f32 -1.442695, %v1612_v13  ;;  %v3020_v31 = vcombine.low %v279_v34, %v283_v36  ;;  %v263_v13 = vld [vmem:[#allocation5 + $0x688] sm:$0xff] }
 0x272   :  { %3150 = vpow2.f32 %v2910_v25  ;;  %v1573_v57 = vpop.f32.mrf.mxu0  ;;  %v1614_v5 = vpop.f32.mrf.mxu1  ;;  %v266_v25 = vld [vmem:[#allocation5 + $0x6a0] sm:$0xff]  ;;  %v267_v0 = vld [vmem:[#allocation5 + $0x6a8] sm:$0xff]  ;;  %v3012_v61 = vcombine.low %v271_v40, %v275_v12  ;;  %v2983_v51 = vcombine.high %v4343_v14, %v4345_v2 }
 0x273   :  { %3152 = vpow2.f32 %v2909_v50  ;;  %v3003_v50 = vcombine.high %v262_v41, %v266_v25  ;;  %v3005_v56 = vcombine.high %v263_v13, %v267_v0  ;;  %v254_v57 = vld [vmem:[#allocation5 + $0x640] sm:$0xff]  ;;  %v3002_v36 = vcombine.low %v262_v41, %v266_v25 }
 0x274   :  { %3154 = vpow2.f32 %v2911_v32 }
 0x275   :  { %2579 = vmatpush2.bf16.xpose.msra.mxu0 %v3034_v11  ;;  %2620 = vmatpush2.bf16.xpose.msra.mxu1 %v3036_v52  ;;  %v258_v52 = vld [vmem:[#allocation5 + $0x660] sm:$0xff] }
 0x276   :  { %2580 = vmatprep.subr.bf16.mxu0 %v3027_v24  ;;  %2621 = vmatprep.subr.bf16.mxu1 %v3029_v54  ;;  %v255_v54 = vld [vmem:[#allocation5 + $0x648] sm:$0xff] }
 0x277   :  { %v2997_v38 = vcombine.high %v255_v54, %v259_v3  ;;  %v2996_v1 = vcombine.low %v255_v54, %v259_v3 }
 0x27d   :  { %2581 = vmatpush2.bf16.xpose.msra.mxu0 %v3026_v28  ;;  %2622 = vmatpush2.bf16.xpose.msra.mxu1 %v3028_v27  ;;  %v3004_v27 = vcombine.low %v263_v13, %v267_v0 }
 0x27e   :  { %v3149_v46 = vpop.eup %3148  ;;  %2582 = vmatprep.subr.bf16.mxu0 %v3019_v47  ;;  %2623 = vmatprep.subr.bf16.mxu1 %v3021_v37  ;;  %v2995_v47 = vcombine.high %v254_v57, %v258_v52  ;;  %v2994_v37 = vcombine.low %v254_v57, %v258_v52 }
 0x27f   :  { %v3151_v15 = vpop.eup %3150  ;;  %v1644_v43 = vadd.f32 1.0, %v3149_v46  ;;  %v4349_v46 = vld [vmem:[#allocation5 + $0x5f8] sm:$0xff] }
 0x280   :  { %v3153_v4 = vpop.eup %3152  ;;  %v1646_v62 = vadd.f32 1.0, %v3151_v15  ;;  %v2986_v15 = vcombine.low %v246_v6, %v250_v16  ;;  %v237_v6 = vld [vmem:[#allocation5 + $0x5b8] sm:$0xff] }
 0x281   :  { %v3155_v59 = vpop.eup %3154  ;;  %3156 = vrcp.f32 %v1644_v43  ;;  %v1645_v53 = vadd.f32 1.0, %v3153_v4 }
 0x282   :  { %3158 = vrcp.f32 %v1646_v62  ;;  %v1647_v55 = vadd.f32 1.0, %v3155_v59 }
 0x283   :  { %3160 = vrcp.f32 %v1645_v53 }
 0x284   :  { %3162 = vrcp.f32 %v1647_v55 }
 0x285   :  { %2583 = vmatpush2.bf16.xpose.msra.mxu0 %v3018_v49  ;;  %2624 = vmatpush2.bf16.xpose.msra.mxu1 %v3020_v31 }
 0x286   :  { %2584 = vmatprep.subr.bf16.mxu0 %v3011_v58  ;;  %2625 = vmatprep.subr.bf16.mxu1 %v3013_v23 }
 0x28d   :  { %2585 = vmatpush2.bf16.xpose.msra.mxu0 %v3010_v26  ;;  %2626 = vmatpush2.bf16.xpose.msra.mxu1 %v3012_v61 }
 0x28e   :  { %v3157_v11 = vpop.eup %3156  ;;  %2586 = vmatprep.subr.bf16.mxu0 %v3003_v50  ;;  %2627 = vmatprep.subr.bf16.mxu1 %v3005_v56 }
 0x28f   :  { %v3159_v32 = vpop.eup %3158  ;;  %v4326_v24 = vmax.f32 %v1439_v9, %v3157_v11  ;;  %v247_v9 = vld [vmem:[#allocation5 + $0x608] sm:$0xff] }
 0x290   :  { %v3161_v5 = vpop.eup %3160  ;;  %v4331_v10 = vmax.f32 %v1441_v18, %v3159_v32  ;;  %v251_v18 = vld [vmem:[#allocation5 + $0x628] sm:$0xff] }
 0x291   :  { %v3163_v34 = vpop.eup %3162  ;;  %v4336_v28 = vmax.f32 %v1440_v22, %v3161_v5  ;;  %v2989_v22 = vcombine.high %v247_v9, %v251_v18  ;;  %v2988_v43 = vcombine.low %v247_v9, %v251_v18  ;;  %v2982_v9 = vcombine.low %v4343_v14, %v4345_v2  ;;  %v229_v14 = vld [vmem:[#allocation5 + $0x578] sm:$0xff] }
 0x292   :  { %v4341_v63 = vmax.f32 %v1442_v19, %v3163_v34  ;;  %v4347_v19 = vld [vmem:[#allocation5 + $0x5d8] sm:$0xff] }
 0x293   :  { %v2985_v60 = vcombine.high %v4347_v19, %v4349_v46 }
 0x295   :  { %2587 = vmatpush2.bf16.xpose.msra.mxu0 %v3002_v36  ;;  %2628 = vmatpush2.bf16.xpose.msra.mxu1 %v3004_v27  ;;  %v232_v36 = vld [vmem:[#allocation5 + $0x590] sm:$0xff] }
 0x296   :  { %2588 = vmatprep.subr.bf16.mxu0 %v2995_v47  ;;  %2629 = vmatprep.subr.bf16.mxu1 %v2997_v38  ;;  %v236_v27 = vld [vmem:[#allocation5 + $0x5b0] sm:$0xff]  ;;  %v233_v38 = vld [vmem:[#allocation5 + $0x598] sm:$0xff] }
 0x297   :  { %v2974_v2 = vcombine.low %v232_v36, %v236_v27 }
 0x29d   :  { %2589 = vmatpush2.bf16.xpose.msra.mxu0 %v2994_v37  ;;  %2630 = vmatpush2.bf16.xpose.msra.mxu1 %v2996_v1  ;;  %v2984_v37 = vcombine.low %v4347_v19, %v4349_v46  ;;  %v2975_v1 = vcombine.high %v232_v36, %v236_v27  ;;  %v216_v46 = vld [vmem:[#allocation5 + $0x510] sm:$0xff] }
 0x29e   :  { %2590 = vmatprep.subr.bf16.mxu0 %v2987_v17  ;;  %2631 = vmatprep.subr.bf16.mxu1 %v2989_v22  ;;  %v2977_v17 = vcombine.high %v233_v38, %v237_v6  ;;  %v225_v22 = vld [vmem:[#allocation5 + $0x558] sm:$0xff] }
 0x29f   :  { %v2969_v19 = vcombine.high %v225_v22, %v229_v14 }
 0x2a5   :  { %2591 = vmatpush2.bf16.xpose.msra.mxu0 %v2986_v15  ;;  %2632 = vmatpush2.bf16.xpose.msra.mxu1 %v2988_v43  ;;  %v2976_v15 = vcombine.low %v233_v38, %v237_v6  ;;  %v196_v38 = vld [vmem:[#allocation5 + $0x470] sm:$0xff]  ;;  %v193_v6 = vld [vmem:[#allocation5 + $0x458] sm:$0xff] }
 0x2a6   :  { %2642 = vmatprep.subr.bf16.mxu0 %v2983_v51  ;;  %2683 = vmatprep.subr.bf16.mxu1 %v2985_v60  ;;  %v220_v51 = vld [vmem:[#allocation5 + $0x530] sm:$0xff]  ;;  %v217_v60 = vld [vmem:[#allocation5 + $0x518] sm:$0xff] }
 0x2ac   :  { %v1715_v4 = vpop.f32.mrf.mxu0  ;;  %v1756_v40 = vpop.f32.mrf.mxu1 }
 0x2ad   :  { %v1716_v62 = vadd.f32 %v1715_v4, %v4920_v30  ;;  %v1757_v12 = vadd.f32 %v1756_v40, %v4036_v39  ;;  %v221_v4 = vld [vmem:[#allocation5 + $0x538] sm:$0xff]  ;;  %v2968_v40 = vcombine.low %v225_v22, %v229_v14 }
 0x2ae   :  { %v1717_v59 = vpop.f32.mrf.mxu0  ;;  %v1758_v55 = vpop.f32.mrf.mxu1 }
 0x2af   :  { %v2914_v53 = vmul.f32 -1.442695, %v1716_v62  ;;  %v1718_v49 = vadd.f32 %v1717_v59, %v4043_v33  ;;  %v2916_v31 = vmul.f32 -1.442695, %v1757_v12  ;;  %v1759_v58 = vadd.f32 %v1758_v55, %v4047_v48  ;;  %v209_v55 = vld [vmem:[#allocation5 + $0x4d8] sm:$0xff] }
 0x2b0   :  { %v1719_v23 = vpop.f32.mrf.mxu0  ;;  %v1760_v25 = vpop.f32.mrf.mxu1  ;;  %v2959_v12 = vcombine.high %v216_v46, %v220_v51  ;;  %v2961_v59 = vcombine.high %v217_v60, %v221_v4 }
 0x2b1   :  { %3164 = vpow2.f32 %v2914_v53  ;;  %v2915_v41 = vmul.f32 -1.442695, %v1718_v49  ;;  %v2917_v13 = vmul.f32 -1.442695, %v1759_v58  ;;  %v208_v53 = vld [vmem:[#allocation5 + $0x4d0] sm:$0xff]  ;;  %v2958_v58 = vcombine.low %v216_v46, %v220_v51  ;;  %v189_v46 = vld [vmem:[#allocation5 + $0x438] sm:$0xff] }
 0x2b2   :  { %3166 = vpow2.f32 %v2916_v31  ;;  %v1720_v0 = vpop.f32.mrf.mxu0  ;;  %v1761_v30 = vpop.f32.mrf.mxu1  ;;  %v212_v49 = vld [vmem:[#allocation5 + $0x4f0] sm:$0xff]  ;;  %v213_v31 = vld [vmem:[#allocation5 + $0x4f8] sm:$0xff] }
 0x2b3   :  { %3168 = vpow2.f32 %v2915_v41  ;;  %v2960_v41 = vcombine.low %v217_v60, %v221_v4  ;;  %v2951_v25 = vcombine.high %v208_v53, %v212_v49  ;;  %v2953_v30 = vcombine.high %v209_v55, %v213_v31 }
 0x2b4   :  { %3170 = vpow2.f32 %v2917_v13  ;;  %v2952_v36 = vcombine.low %v209_v55, %v213_v31 }
 0x2be   :  { %v3165_v26 = vpop.eup %3164 }
 0x2bf   :  { %v3167_v39 = vpop.eup %3166  ;;  %v1869_v61 = vadd.f32 1.0, %v3165_v26 }
 0x2c0   :  { %v3169_v50 = vpop.eup %3168  ;;  %v1871_v56 = vadd.f32 1.0, %v3167_v39 }
 0x2c1   :  { %v3171_v33 = vpop.eup %3170  ;;  %3172 = vrcp.f32 %v1869_v61  ;;  %v1870_v11 = vadd.f32 1.0, %v3169_v50 }
 0x2c2   :  { %3174 = vrcp.f32 %v1871_v56  ;;  %v1872_v48 = vadd.f32 1.0, %v3171_v33 }
 0x2c3   :  { %3176 = vrcp.f32 %v1870_v11 }
 0x2c4   :  { %3178 = vrcp.f32 %v1872_v48 }
 0x2ce   :  { %v3173_v32 = vpop.eup %3172 }
 0x2cf   :  { %v3175_v57 = vpop.eup %3174  ;;  %v1893_v5 = vmax.f32 %v4302_v20, %v3173_v32 }
 0x2d0   :  { %v3177_v52 = vpop.eup %3176  ;;  %v1895_v34 = vmax.f32 %v4307_v8, %v3175_v57  ;;  %v224_v8 = vld [vmem:[#allocation5 + $0x550] sm:$0xff] }
 0x2d1   :  { %v3179_v54 = vpop.eup %3178  ;;  %v1894_v3 = vmax.f32 %v4312_v21, %v3177_v52  ;;  %v1901_v20 = vpack.c.bf16 %v1893_v5, %v1893_v5  ;;  %v204_v57 = vld [vmem:[#allocation5 + $0x4b0] sm:$0xff]  ;;  %v201_v5 = vld [vmem:[#allocation5 + $0x498] sm:$0xff] }
 0x2d2   :  { %v1896_v47 = vmax.f32 %v4317_v44, %v3179_v54  ;;  %v1903_v21 = vpack.c.bf16 %v1895_v34, %v1895_v34  ;;  %v228_v44 = vld [vmem:[#allocation5 + $0x570] sm:$0xff]  ;;  %v205_v54 = vld [vmem:[#allocation5 + $0x4b8] sm:$0xff] }
 0x2d3   :  { %v1902_v16 = vpack.c.bf16 %v1894_v3, %v1894_v3  ;;  %v2967_v43 = vcombine.high %v224_v8, %v228_v44  ;;  %v2966_v62 = vcombine.low %v224_v8, %v228_v44  ;;  %v2945_v27 = vcombine.high %v201_v5, %v205_v54 }
 0x2d4   :  { %v1904_v18 = vpack.c.bf16 %v1896_v47, %v1896_v47  ;;  %v192_v47 = vld [vmem:[#allocation5 + $0x450] sm:$0xff] }
 0x2d5   :  { %2592 = vmatprep.mubr.bf16.mxu0 %v1902_v16  ;;  %v197_v16 = vld [vmem:[#allocation5 + $0x478] sm:$0xff]  ;;  %v2934_v51 = vcombine.low %v192_v47, %v196_v38 }
 0x2d6   :  { %2633 = vmatprep.mubr.bf16.mxu1 %v1904_v18  ;;  %2593 = vmatmul.mubr.bf16.vlgmr.msra.gmra.mxu0 %v1901_v20  ;;  %v2944_v18 = vcombine.low %v201_v5, %v205_v54  ;;  %v2937_v20 = vcombine.high %v193_v6, %v197_v16  ;;  %v2936_v60 = vcombine.low %v193_v6, %v197_v16  ;;  %v272_v16 = vld [vmem:[#allocation5 + $0x6d0] sm:$0xff] }
 0x2d7   :  { %2634 = vmatmul.mubr.bf16.vlgmr.msra.gmra.mxu1 %v1903_v21  ;;  %2643 = vmatpush1.bf16.xpose.msra.mxu0 %v2982_v9 }
 0x2d8   :  { %2684 = vmatpush1.bf16.xpose.msra.mxu1 %v2984_v37  ;;  %2644 = vmatprep.subr.bf16.mxu0 %v2975_v1  ;;  %v2935_v37 = vcombine.high %v192_v47, %v196_v38 }
 0x2d9   :  { %2685 = vmatprep.subr.bf16.mxu1 %v2977_v17 }
 0x2df   :  { %2645 = vmatpush1.bf16.xpose.msra.mxu0 %v2974_v2  ;;  %v184_v2 = vld [vmem:[#allocation5 + $0x410] sm:$0xff] }
 0x2e0   :  { %2686 = vmatpush1.bf16.xpose.msra.mxu1 %v2976_v15  ;;  %2646 = vmatprep.subr.bf16.mxu0 %v2967_v43  ;;  %v188_v15 = vld [vmem:[#allocation5 + $0x430] sm:$0xff] }
 0x2e1   :  { %2687 = vmatprep.subr.bf16.mxu1 %v2969_v19  ;;  %v185_v19 = vld [vmem:[#allocation5 + $0x418] sm:$0xff]  ;;  %v2927_v4 = vcombine.high %v184_v2, %v188_v15 }
 0x2e2   :  { %v2928_v55 = vcombine.low %v185_v19, %v189_v46 }
 0x2e7   :  { %2647 = vmatpush1.bf16.xpose.msra.mxu0 %v2966_v62  ;;  %v2929_v62 = vcombine.high %v185_v19, %v189_v46  ;;  %v256_v46 = vld [vmem:[#allocation5 + $0x650] sm:$0xff] }
 0x2e8   :  { %2688 = vmatpush1.bf16.xpose.msra.mxu1 %v2968_v40  ;;  %2648 = vmatprep.subr.bf16.mxu0 %v2959_v12  ;;  %v304_v40 = vld [vmem:[#allocation5 + $0x7d0] sm:$0xff] }
 0x2e9   :  { %2689 = vmatprep.subr.bf16.mxu1 %v2961_v59  ;;  %v308_v12 = vld [vmem:[#allocation5 + $0x7f0] sm:$0xff]  ;;  %v305_v59 = vld [vmem:[#allocation5 + $0x7d8] sm:$0xff] }
 0x2ea   :  { %v3047_v31 = vcombine.high %v304_v40, %v308_v12 }
 0x2ec   :  { %v1797_v23 = vpop.f32.mrf.mxu0  ;;  %v1838_v0 = vpop.f32.mrf.mxu1 }
 0x2ed   :  { %v1798_v13 = vadd.f32 %v1797_v23, %v4160_v29  ;;  %v1839_v26 = vadd.f32 %v1838_v0, %v4164_v35  ;;  %v200_v29 = vld [vmem:[#allocation5 + $0x490] sm:$0xff] }
 0x2ee   :  { %v1799_v39 = vpop.f32.mrf.mxu0  ;;  %v1840_v56 = vpop.f32.mrf.mxu1  ;;  %v2942_v9 = vcombine.low %v200_v29, %v204_v57 }
 0x2ef   :  { %v2918_v61 = vmul.f32 -1.442695, %v1798_v13  ;;  %v1800_v50 = vadd.f32 %v1799_v39, %v4169_v42  ;;  %2649 = vmatpush1.bf16.xpose.msra.mxu0 %v2958_v58  ;;  %v2920_v33 = vmul.f32 -1.442695, %v1839_v26  ;;  %v1841_v11 = vadd.f32 %v1840_v56, %v4173_v45  ;;  %v296_v39 = vld [vmem:[#allocation5 + $0x790] sm:$0xff]  ;;  %v297_v56 = vld [vmem:[#allocation5 + $0x798] sm:$0xff] }
 0x2f0   :  { %2690 = vmatpush1.bf16.xpose.msra.mxu1 %v2960_v41  ;;  %2650 = vmatprep.subr.bf16.mxu0 %v2951_v25  ;;  %v1801_v48 = vpop.f32.mrf.mxu0  ;;  %v1842_v52 = vpop.f32.mrf.mxu1  ;;  %v2950_v42 = vcombine.low %v208_v53, %v212_v49  ;;  %v2943_v45 = vcombine.high %v200_v29, %v204_v57  ;;  %v309_v53 = vld [vmem:[#allocation5 + $0x7f8] sm:$0xff]  ;;  %v2926_v49 = vcombine.low %v184_v2, %v188_v15 }
 0x2f1   :  { %3180 = vpow2.f32 %v2918_v61  ;;  %v2919_v32 = vmul.f32 -1.442695, %v1800_v50  ;;  %2691 = vmatprep.subr.bf16.mxu1 %v2953_v30  ;;  %v2921_v35 = vmul.f32 -1.442695, %v1841_v11  ;;  %v3049_v58 = vcombine.high %v305_v59, %v309_v53  ;;  %v300_v61 = vld [vmem:[#allocation5 + $0x7b0] sm:$0xff]  ;;  %v289_v52 = vld [vmem:[#allocation5 + $0x758] sm:$0xff] }
 0x2f2   :  { %3182 = vpow2.f32 %v2920_v33  ;;  %v1802_v3 = vpop.f32.mrf.mxu0  ;;  %v1843_v34 = vpop.f32.mrf.mxu1  ;;  %v301_v33 = vld [vmem:[#allocation5 + $0x7b8] sm:$0xff]  ;;  %v3046_v11 = vcombine.low %v304_v40, %v308_v12  ;;  %v3039_v29 = vcombine.high %v296_v39, %v300_v61  ;;  %v3038_v5 = vcombine.low %v296_v39, %v300_v61 }
 0x2f3   :  { %3184 = vpow2.f32 %v2919_v32  ;;  %v3041_v57 = vcombine.high %v297_v56, %v301_v33  ;;  %v284_v34 = vld [vmem:[#allocation5 + $0x730] sm:$0xff] }
 0x2f4   :  { %3186 = vpow2.f32 %v2921_v35  ;;  %v293_v35 = vld [vmem:[#allocation5 + $0x778] sm:$0xff] }
 0x2f5   :  { %v3033_v3 = vcombine.high %v289_v52, %v293_v35  ;;  %v3032_v47 = vcombine.low %v289_v52, %v293_v35 }
 0x2f7   :  { %2651 = vmatpush1.bf16.xpose.msra.mxu0 %v2950_v42  ;;  %v280_v42 = vld [vmem:[#allocation5 + $0x710] sm:$0xff] }
 0x2f8   :  { %2692 = vmatpush1.bf16.xpose.msra.mxu1 %v2952_v36  ;;  %2652 = vmatprep.subr.bf16.mxu0 %v2943_v45  ;;  %v281_v36 = vld [vmem:[#allocation5 + $0x718] sm:$0xff]  ;;  %v3023_v38 = vcombine.high %v280_v42, %v284_v34 }
 0x2f9   :  { %2693 = vmatprep.subr.bf16.mxu1 %v2945_v27  ;;  %v285_v45 = vld [vmem:[#allocation5 + $0x738] sm:$0xff] }
 0x2fa   :  { %v3025_v6 = vcombine.high %v281_v36, %v285_v45 }
 0x2fe   :  { %v3181_v1 = vpop.eup %3180 }
 0x2ff   :  { %v3183_v21 = vpop.eup %3182  ;;  %v1873_v17 = vadd.f32 1.0, %v3181_v1  ;;  %2653 = vmatpush1.bf16.xpose.msra.mxu0 %v2942_v9  ;;  %v276_v9 = vld [vmem:[#allocation5 + $0x6f0] sm:$0xff]  ;;  %v3024_v1 = vcombine.low %v281_v36, %v285_v45 }
 0x300   :  { %v3185_v8 = vpop.eup %3184  ;;  %v1875_v44 = vadd.f32 1.0, %v3183_v21  ;;  %2694 = vmatpush1.bf16.xpose.msra.mxu1 %v2944_v18  ;;  %2654 = vmatprep.subr.bf16.mxu0 %v2935_v37  ;;  %v273_v18 = vld [vmem:[#allocation5 + $0x6d8] sm:$0xff]  ;;  %v3015_v21 = vcombine.high %v272_v16, %v276_v9  ;;  %v3014_v2 = vcombine.low %v272_v16, %v276_v9 }
 0x301   :  { %v3187_v22 = vpop.eup %3186  ;;  %3188 = vrcp.f32 %v1873_v17  ;;  %v1874_v14 = vadd.f32 1.0, %v3185_v8  ;;  %2695 = vmatprep.subr.bf16.mxu1 %v2937_v20  ;;  %v277_v37 = vld [vmem:[#allocation5 + $0x6f8] sm:$0xff]  ;;  %v3022_v20 = vcombine.low %v280_v42, %v284_v34  ;;  %v264_v8 = vld [vmem:[#allocation5 + $0x690] sm:$0xff] }
 0x302   :  { %3190 = vrcp.f32 %v1875_v44  ;;  %v1876_v43 = vadd.f32 1.0, %v3187_v22  ;;  %v3017_v17 = vcombine.high %v273_v18, %v277_v37  ;;  %v268_v44 = vld [vmem:[#allocation5 + $0x6b0] sm:$0xff]  ;;  %v265_v22 = vld [vmem:[#allocation5 + $0x698] sm:$0xff]  ;;  %v3016_v15 = vcombine.low %v273_v18, %v277_v37 }
 0x303   :  { %3192 = vrcp.f32 %v1874_v14  ;;  %v269_v14 = vld [vmem:[#allocation5 + $0x6b8] sm:$0xff] }
 0x304   :  { %3194 = vrcp.f32 %v1876_v43  ;;  %v3007_v43 = vcombine.high %v264_v8, %v268_v44  ;;  %v3009_v19 = vcombine.high %v265_v22, %v269_v14  ;;  %v3008_v40 = vcombine.low %v265_v22, %v269_v14 }
 0x307   :  { %2655 = vmatpush1.bf16.xpose.msra.mxu0 %v2934_v51  ;;  %v260_v51 = vld [vmem:[#allocation5 + $0x670] sm:$0xff] }
 0x308   :  { %2696 = vmatpush1.bf16.xpose.msra.mxu1 %v2936_v60  ;;  %2656 = vmatprep.subr.bf16.mxu0 %v2927_v4  ;;  %v257_v60 = vld [vmem:[#allocation5 + $0x658] sm:$0xff]  ;;  %v2999_v12 = vcombine.high %v256_v46, %v260_v51 }
 0x309   :  { %2697 = vmatprep.subr.bf16.mxu1 %v2929_v62  ;;  %v261_v4 = vld [vmem:[#allocation5 + $0x678] sm:$0xff]  ;;  %v3006_v62 = vcombine.low %v264_v8, %v268_v44 }
 0x30e   :  { %v3189_v23 = vpop.eup %3188 }
 0x30f   :  { %v3191_v41 = vpop.eup %3190  ;;  %2657 = vmatpush1.bf16.xpose.msra.mxu0 %v2926_v49  ;;  %v4372_v25 = vmax.f32 %v4326_v24, %v3189_v23  ;;  %v3048_v24 = vcombine.low %v305_v59, %v309_v53  ;;  %v3001_v59 = vcombine.high %v257_v60, %v261_v4  ;;  %v248_v53 = vld [vmem:[#allocation5 + $0x610] sm:$0xff]  ;;  %v3000_v23 = vcombine.low %v257_v60, %v261_v4 }
 0x310   :  { %v3193_v13 = vpop.eup %3192  ;;  %2698 = vmatpush1.bf16.xpose.msra.mxu1 %v2928_v55  ;;  %2658 = vmatprep.subr.bf16.mxu0 %v3047_v31  ;;  %v4375_v0 = vmax.f32 %v4331_v10, %v3191_v41  ;;  %v288_v10 = vld [vmem:[#allocation5 + $0x750] sm:$0xff]  ;;  %v249_v55 = vld [vmem:[#allocation5 + $0x618] sm:$0xff] }
 0x311   :  { %v3195_v30 = vpop.eup %3194  ;;  %v1898_v26 = vmax.f32 %v4336_v28, %v3193_v13  ;;  %2699 = vmatprep.subr.bf16.mxu1 %v3049_v58  ;;  %v292_v28 = vld [vmem:[#allocation5 + $0x770] sm:$0xff]  ;;  %v253_v31 = vld [vmem:[#allocation5 + $0x638] sm:$0xff]  ;;  %v2998_v58 = vcombine.low %v256_v46, %v260_v51  ;;  %v1905_v39 = vpack.c.bf16 %v4372_v25, %v4372_v25 }
 0x312   :  { %v1900_v50 = vmax.f32 %v4341_v63, %v3195_v30  ;;  %v3040_v63 = vcombine.low %v297_v56, %v301_v33  ;;  %v3031_v54 = vcombine.high %v288_v10, %v292_v28  ;;  %v3030_v27 = vcombine.low %v288_v10, %v292_v28  ;;  %v252_v49 = vld [vmem:[#allocation5 + $0x630] sm:$0xff] }
 0x313   :  { %v1906_v48 = vpack.c.bf16 %v1898_v26, %v1898_v26  ;;  %v2991_v41 = vcombine.high %v248_v53, %v252_v49  ;;  %v2993_v13 = vcombine.high %v249_v55, %v253_v31  ;;  %v2990_v30 = vcombine.low %v248_v53, %v252_v49 }
 0x314   :  { %v1908_v32 = vpack.c.bf16 %v1900_v50, %v1900_v50  ;;  %v2992_v26 = vcombine.low %v249_v55, %v253_v31  ;;  %v1907_v61 = vpack.c.bf16 %v4375_v0, %v4375_v0  ;;  %v312_v50 = vld [vmem:[#allocation7 + $0x1] ss:$2 sm:$0x3]  ;;  %v4921_v56 = vsub.s32 0, %v4013_v7 }
 0x315   :  { %2674 = vmatprep.mubr.bf16.mxu0 %v1906_v48 }
 0x316   :  { %2715 = vmatprep.mubr.bf16.mxu1 %v1908_v32  ;;  %v1913_v33 = vrot.slane %v312_v50, %v4921_v56 }
 0x317   :  { %2659 = vmatpush2.bf16.xpose.msra.mxu0 %v3046_v11  ;;  %v4922_v11 = vsub.s32 1, %v4013_v7 }
 0x318   :  { %2700 = vmatpush2.bf16.xpose.msra.mxu1 %v3048_v24  ;;  %2660 = vmatprep.subr.bf16.mxu0 %v3039_v29 }
 0x319   :  { %2701 = vmatprep.subr.bf16.mxu1 %v3041_v57  ;;  %v1917_v48 = vrot.slane %v312_v50, %v4922_v11 }
 0x31f   :  { %2661 = vmatpush2.bf16.xpose.msra.mxu0 %v3038_v5 }
 0x320   :  { %2702 = vmatpush2.bf16.xpose.msra.mxu1 %v3040_v63  ;;  %2662 = vmatprep.subr.bf16.mxu0 %v3031_v54 }
 0x321   :  { %2703 = vmatprep.subr.bf16.mxu1 %v3033_v3 }
 0x327   :  { %2663 = vmatpush2.bf16.xpose.msra.mxu0 %v3030_v27 }
 0x328   :  { %2704 = vmatpush2.bf16.xpose.msra.mxu1 %v3032_v47  ;;  %2664 = vmatprep.subr.bf16.mxu0 %v3023_v38 }
 0x329   :  { %2705 = vmatprep.subr.bf16.mxu1 %v3025_v6 }
 0x32f   :  { %2665 = vmatpush2.bf16.xpose.msra.mxu0 %v3022_v20 }
 0x330   :  { %2706 = vmatpush2.bf16.xpose.msra.mxu1 %v3024_v1  ;;  %2666 = vmatprep.subr.bf16.mxu0 %v3015_v21 }
 0x331   :  { %2707 = vmatprep.subr.bf16.mxu1 %v3017_v17 }
 0x337   :  { %2667 = vmatpush2.bf16.xpose.msra.mxu0 %v3014_v2 }
 0x338   :  { %2708 = vmatpush2.bf16.xpose.msra.mxu1 %v3016_v15  ;;  %2668 = vmatprep.subr.bf16.mxu0 %v3007_v43 }
 0x339   :  { %2709 = vmatprep.subr.bf16.mxu1 %v3009_v19 }
 0x33f   :  { %2669 = vmatpush2.bf16.xpose.msra.mxu0 %v3006_v62 }
 0x340   :  { %2710 = vmatpush2.bf16.xpose.msra.mxu1 %v3008_v40  ;;  %2670 = vmatprep.subr.bf16.mxu0 %v2999_v12 }
 0x341   :  { %2711 = vmatprep.subr.bf16.mxu1 %v3001_v59 }
 0x347   :  { %2671 = vmatpush2.bf16.xpose.msra.mxu0 %v2998_v58 }
 0x348   :  { %2712 = vmatpush2.bf16.xpose.msra.mxu1 %v3000_v23  ;;  %2672 = vmatprep.subr.bf16.mxu0 %v2991_v41 }
 0x349   :  { %2713 = vmatprep.subr.bf16.mxu1 %v2993_v13 }
 0x34f   :  { %2673 = vmatpush2.bf16.xpose.msra.mxu0 %v2990_v30 }
 0x350   :  { %2714 = vmatpush2.bf16.xpose.msra.mxu1 %v2992_v26 }
 0x356   :  { %2675 = vmatmul.mubr.bf16.vlgmr.msra.gmra.mxu0 %v1905_v39 }
 0x357   :  { %2716 = vmatmul.mubr.bf16.vlgmr.msra.gmra.mxu1 %v1907_v61 }
 0x396   :  { %v2594_v24 = vpop.f32.mrf.mxu0 }
 0x397   :  { %v2595_v32 = vadd.f32 %v2594_v24, %v1913_v33  ;;  %v2635_v29 = vpop.f32.mrf.mxu1 }
 0x398   :  { %v2596_v57 = vpop.f32.mrf.mxu0 }
 0x399   :  { %v2636_v10 = vadd.f32 %v2635_v29, %v2595_v32  ;;  %v2597_v28 = vadd.f32 %v2596_v57, %v1917_v48  ;;  %v2637_v52 = vpop.f32.mrf.mxu1 }
 0x39a   :  { %v2598_v25 = vpop.f32.mrf.mxu0 }
 0x39b   :  { %v2638_v35 = vadd.f32 %v2637_v52, %v2597_v28  ;;  %v2639_v5 = vpop.f32.mrf.mxu1 }
 0x39c   :  { %v2599_v0 = vpop.f32.mrf.mxu0 }
 0x39d   :  { %v2640_v63 = vpop.f32.mrf.mxu1 }
 0x416   :  { %v2676_v54 = vpop.f32.mrf.mxu0 }
 0x417   :  { %v2677_v3 = vadd.f32 %v2676_v54, %v2636_v10  ;;  %v2717_v42 = vpop.f32.mrf.mxu1 }
 0x418   :  { %v2678_v34 = vpop.f32.mrf.mxu0 }
 0x419   :  { %v2718_v36 = vadd.f32 %v2717_v42, %v2677_v3  ;;  %v2679_v45 = vadd.f32 %v2678_v34, %v2638_v35  ;;  %v2719_v7 = vpop.f32.mrf.mxu1 }
 0x41a   :  { %v2680_v27 = vpop.f32.mrf.mxu0 }
 0x41b   :  { %v3050_v47 = vmul.f32 -1.442695, %v2718_v36  ;;  %v2720_v38 = vadd.f32 %v2719_v7, %v2679_v45  ;;  %v2721_v6 = vpop.f32.mrf.mxu1 }
 0x41c   :  { %v2681_v16 = vpop.f32.mrf.mxu0 }
 0x41d   :  { %3196 = vpow2.f32 %v3050_v47  ;;  %v3051_v9 = vmul.f32 -1.442695, %v2720_v38  ;;  %v2722_v18 = vpop.f32.mrf.mxu1 }
 0x41f   :  { %3198 = vpow2.f32 %v3051_v9 }
 0x42a   :  { %v3197_v37 = vpop.eup %3196 }
 0x42b   :  { %v2730_v20 = vadd.f32 1.0, %v3197_v37 }
 0x42c   :  { %v3199_v1 = vpop.eup %3198 }
 0x42d   :  { %3200 = vrcp.f32 %v2730_v20  ;;  %v2731_v21 = vadd.f32 1.0, %v3199_v1 }
 0x42f   :  { %3202 = vrcp.f32 %v2731_v21 }
 0x43a   :  { %v3201_v17 = vpop.eup %3200 }
 0x43b   :  { %2736 = vst [vmem:[#allocation8] sm:$0xff] %v3201_v17 }
 0x43c   :  { %v3203_v8 = vpop.eup %3202 }
 0x43d   :  { %2737 = vst [vmem:[#allocation8 + $0x8] sm:$0xff] %v3203_v8 }
 0x43e   :  { %3275 = shalt.err (!%p3272_p5)
}
 0x43f   :  { %2747 = dma.vmem_to_hbm [thread:$0]  %s2745_s2, 256, %s4393_s3, [#allocation4]  }
 0x440   :  { %3288 = dma.done.wait [#allocation4], 256  }
 0x441   :  { %3289 = vsyncadd [#allocation4], 4294967040 }
 0x442   :  { %2751 = vsyncpa [#allocation3], 1 }
 0x443   :  { %2752 = vsyncpa [#allocation6], 1 }
 0x444   :  { %2753 = vsyncpa [#allocation4], 1 }

</bundles_post_ra>
